<compile_context>
chip_gen: v7x
topology: tpu7x:2x2x1
jax: 0.10.0
libtpu: 0.0.40
codegen_flags: <defaults>
</compile_context>

<pallas_src>
import functools

import jax
import jax.numpy as jnp
from jax.experimental import pallas as pl
from jax.experimental.pallas import tpu as pltpu


# ---------------------------------------------------------------------------
# Fused kernel (stride == 1): conv as kh*kw shifted matmuls + BN shift + ReLU
# ---------------------------------------------------------------------------
def _fused_conv_bn_relu_kernel(x_ref, w_ref, shift_ref, o_ref, *, kh, kw, th, wo, cin):
    # x_ref:     (1, Hp, Wp, cin) bf16  zero-padded image (VMEM-resident per batch)
    # w_ref:     (kh*kw*cin, TN)  bf16  weight panel, BN scale folded, K order (kh,kw,cin)
    # shift_ref: (1, TN)          f32   folded BN shift = beta - mean*scale
    # o_ref:     (1, th*wo, TN)         output tile (row tile flattened over (h, w))
    r0 = pl.program_id(2) * th          # first output row of this tile (stride == 1)
    tn = o_ref.shape[-1]
    acc = jnp.zeros((th * wo, tn), jnp.float32)
    for dh in range(kh):                # unrolled: kh*kw MXU matmuls per tile
        for dw in range(kw):
            patch = x_ref[0, pl.ds(r0 + dh, th), pl.ds(dw, wo), :]     # (th, wo, cin)
            patch = patch.reshape(th * wo, cin)
            w_slc = w_ref[pl.ds((dh * kw + dw) * cin, cin), :]         # (cin, TN)
            acc += jnp.dot(patch, w_slc, preferred_element_type=jnp.float32)
    o_ref[0] = jnp.maximum(acc + shift_ref[...], 0.0).astype(o_ref.dtype)


# ---------------------------------------------------------------------------
# Fallback kernel (stride != 1): im2col matmul + BN shift + ReLU epilogue
# ---------------------------------------------------------------------------
def _matmul_shift_relu_kernel(p_ref, w_ref, shift_ref, o_ref, acc_ref, *, tk):
    # p_ref: (TM, TK) bf16 im2col tile; w_ref: (K_pad, TN) bf16 resident weight panel
    kk = pl.program_id(2)

    @pl.when(kk == 0)
    def _init():
        acc_ref[...] = jnp.zeros_like(acc_ref)

    k0 = pl.multiple_of(kk * tk, 128)
    acc_ref[...] += jnp.dot(p_ref[...], w_ref[pl.ds(k0, tk), :],
                            preferred_element_type=jnp.float32)

    @pl.when(kk == pl.num_programs(2) - 1)
    def _epilogue():
        o_ref[...] = jnp.maximum(acc_ref[...] + shift_ref[...], 0.0).astype(o_ref.dtype)


# ---------------------------------------------------------------------------
# Host-side glue
# ---------------------------------------------------------------------------
def _round_up(x, m):
    return ((x + m - 1) // m) * m


def _largest_divisor_tile(padded, candidates):
    """Largest candidate dividing `padded` (padded is already a multiple of 128)."""
    for c in candidates:
        if padded % c == 0:
            return c
    return candidates[-1]


def _pick_row_tile(h_out, w_out, target_rows=1024):
    """th | h_out with th*w_out <= target_rows and th*w_out a valid
    second-to-last block dim (multiple of 8, or the full h_out*w_out)."""
    valid = [d for d in range(1, h_out + 1)
             if h_out % d == 0 and (d == h_out or (d * w_out) % 8 == 0)]
    fitting = [d for d in valid if d * w_out <= target_rows]
    return max(fitting) if fitting else min(valid)


@functools.partial(jax.jit, static_argnames=("stride", "padding"))
def basic_conv2d(x, conv_w, bn_gamma, bn_beta, bn_mean, bn_var, *, stride=1, padding=0):
    """BasicConv2d forward (eval-mode BN). x: (N, Cin, H, W); conv_w: (Cout, Cin, KH, KW)."""
    eps = 1e-3  # matches nn.BatchNorm2d(out_channels, eps=0.001)
    sh, sw = (stride, stride) if isinstance(stride, int) else tuple(stride)
    ph, pw = (padding, padding) if isinstance(padding, int) else tuple(padding)
    n, c_in, h, w = x.shape
    c_out, _, kh, kw = conv_w.shape
    out_dtype = x.dtype
    h_out = (h + 2 * ph - kh) // sh + 1
    w_out = (w + 2 * pw - kw) // sw + 1

    # --- folded eval-mode BN; scale folded into the weights in f32 -----------
    scale = bn_gamma.astype(jnp.float32) / jnp.sqrt(bn_var.astype(jnp.float32) + eps)
    shift = bn_beta.astype(jnp.float32) - bn_mean.astype(jnp.float32) * scale

    cin_pad = _round_up(c_in, 8)      # sublane-friendly contraction dim
    cout_pad = _round_up(c_out, 128)  # lane-dense output columns

    w_f32 = conv_w.astype(jnp.float32) * scale[:, None, None, None]
    w_f32 = jnp.pad(w_f32, ((0, cout_pad - c_out), (0, cin_pad - c_in), (0, 0), (0, 0)))
    # (Cout_p, Cin_p, KH, KW) -> (KH, KW, Cin_p, Cout_p) -> (K_total, Cout_p), K order (kh,kw,cin)
    w_mat = jnp.transpose(w_f32, (2, 3, 1, 0)).reshape(kh * kw * cin_pad, cout_pad)
    w_mat = w_mat.astype(jnp.bfloat16)
    shift_p = jnp.pad(shift, (0, cout_pad - c_out)).reshape(1, cout_pad)

    # --- bf16 NHWC input, zero-padded (spatial + channel) once ---------------
    x_nhwc = jnp.transpose(x, (0, 2, 3, 1)).astype(jnp.bfloat16)
    xp = jnp.pad(x_nhwc, ((0, 0), (ph, ph), (pw, pw), (0, cin_pad - c_in)))
    hp, wp = h + 2 * ph, w + 2 * pw
    k_total = kh * kw * cin_pad
    out_bytes = jnp.dtype(out_dtype).itemsize
    tn = _largest_divisor_tile(cout_pad, (512, 256, 128))

    if (sh, sw) == (1, 1):
        # ---- fused path: padded image resident in VMEM, shifted views sliced in-kernel
        th = _pick_row_tile(h_out, w_out)
        # v7x has 2 TensorCores: make sure the parallel grid axes yield >= 2 tiles.
        if n * (cout_pad // tn) * (h_out // th) == 1:
            th_half = _pick_row_tile(h_out, w_out, target_rows=max(8, (th * w_out) // 2))
            if th_half < th:
                th = th_half
            elif cout_pad % 256 == 0:
                tn = cout_pad // 2
        grid = (n, cout_pad // tn, h_out // th)

        vmem_need = (2 * hp * wp * cin_pad * 2          # resident image (double-buffered)
                     + 2 * k_total * tn * 2             # weight panel (double-buffered)
                     + 2 * th * w_out * tn * out_bytes  # output tile (double-buffered)
                     + th * w_out * (tn + cin_pad) * 4  # f32 accumulator + patch temporaries
                     + 4 * tn * 4)
        vmem_limit = min(max(int(vmem_need * 1.5) + (4 << 20), 16 << 20), 48 << 20)

        kernel = functools.partial(_fused_conv_bn_relu_kernel,
                                   kh=kh, kw=kw, th=th, wo=w_out, cin=cin_pad)
        out_flat = pl.pallas_call(
            kernel,
            out_shape=jax.ShapeDtypeStruct((n, h_out * w_out, cout_pad), out_dtype),
            grid_spec=pltpu.PrefetchScalarGridSpec(
                num_scalar_prefetch=0,
                grid=grid,
                in_specs=[
                    pl.BlockSpec((1, hp, wp, cin_pad), lambda b, j, r: (b, 0, 0, 0)),
                    pl.BlockSpec((k_total, tn), lambda b, j, r: (0, j)),
                    pl.BlockSpec((1, tn), lambda b, j, r: (0, j)),
                ],
                out_specs=pl.BlockSpec((1, th * w_out, tn), lambda b, j, r: (b, r, j)),
            ),
            compiler_params=pltpu.CompilerParams(
                dimension_semantics=("parallel", "parallel", "parallel"),
                vmem_limit_bytes=vmem_limit,
            ),
        )(xp, w_mat, shift_p)
        out_nhwc = out_flat[:, :, :c_out].reshape(n, h_out, w_out, c_out)
    else:
        # ---- stride != 1: im2col matmul fallback ------------------------------
        # TODO(synk): a strided fully-fused variant would need strided VMEM slicing;
        # until then strided convs pay the im2col HBM cost.
        cols = []
        for dh in range(kh):
            for dw in range(kw):
                cols.append(xp[:, dh: dh + sh * h_out: sh, dw: dw + sw * w_out: sw, :])
        patches = jnp.stack(cols, axis=3).reshape(n * h_out * w_out, k_total)

        m = n * h_out * w_out
        m_pad = _round_up(m, 128)
        k_pad = _round_up(k_total, 128)
        tm = _largest_divisor_tile(m_pad, (1024, 512, 256, 128))
        tk = _largest_divisor_tile(k_pad, (512, 256, 128))
        patches_p = jnp.pad(patches, ((0, m_pad - m), (0, k_pad - k_total)))
        w_p = jnp.pad(w_mat, ((0, k_pad - k_total), (0, 0)))
        # j outermost so the (K_pad, TN) weight panel stays resident across all row tiles.
        grid = (cout_pad // tn, m_pad // tm, k_pad // tk)

        vmem_need = (2 * tm * tk * 2 + 2 * k_pad * tn * 2 + 2 * tm * tn * out_bytes
                     + tm * tn * 4 + 4 * tn * 4)
        vmem_limit = min(max(int(vmem_need * 1.5) + (4 << 20), 16 << 20), 48 << 20)

        kernel = functools.partial(_matmul_shift_relu_kernel, tk=tk)
        out_flat = pl.pallas_call(
            kernel,
            out_shape=jax.ShapeDtypeStruct((m_pad, cout_pad), out_dtype),
            grid_spec=pltpu.PrefetchScalarGridSpec(
                num_scalar_prefetch=0,
                grid=grid,
                in_specs=[
                    pl.BlockSpec((tm, tk), lambda j, i, kk: (i, kk)),
                    pl.BlockSpec((k_pad, tn), lambda j, i, kk: (0, j)),
                    pl.BlockSpec((1, tn), lambda j, i, kk: (0, j)),
                ],
                out_specs=pl.BlockSpec((tm, tn), lambda j, i, kk: (i, j)),
                scratch_shapes=[pltpu.VMEM((tm, tn), jnp.float32)],
            ),
            compiler_params=pltpu.CompilerParams(
                dimension_semantics=("parallel", "parallel", "arbitrary"),
                vmem_limit_bytes=vmem_limit,
            ),
        )(patches_p, w_p, shift_p)
        out_nhwc = out_flat[:m, :c_out].reshape(n, h_out, w_out, c_out)

    # back to NCHW to match the PyTorch module's interface
    return jnp.transpose(out_nhwc, (0, 3, 1, 2))


def _reference(x, conv_w, bn_gamma, bn_beta, bn_mean, bn_var, stride=1, padding=1):
    """Pure-JAX f32 reference (eval-mode BN) for the correctness check."""
    eps = 1e-3
    sh, sw = (stride, stride) if isinstance(stride, int) else tuple(stride)
    ph, pw = (padding, padding) if isinstance(padding, int) else tuple(padding)
    y = jax.lax.conv_general_dilated(
        x, conv_w, window_strides=(sh, sw),
        padding=[(ph, ph), (pw, pw)],
        dimension_numbers=("NCHW", "OIHW", "NCHW"),
    )
    scale = bn_gamma / jnp.sqrt(bn_var + eps)
    y = y * scale[None, :, None, None] + (bn_beta - bn_mean * scale)[None, :, None, None]
    return jnp.maximum(y, 0.0)


if __name__ == "__main__":
    # Small, deterministic example: BasicConv2d(4, 8, kernel_size=3, padding=1)
    key = jax.random.PRNGKey(0)
    k_x, k_w, k_g, k_b, k_m, k_v = jax.random.split(key, 6)

    N, C_IN, H, W = 2, 4, 16, 16
    C_OUT, KH, KW = 8, 3, 3

    x = jax.random.normal(k_x, (N, C_IN, H, W), dtype=jnp.float32)
    conv_w = jax.random.normal(k_w, (C_OUT, C_IN, KH, KW), dtype=jnp.float32) * 0.1
    bn_gamma = 1.0 + 0.1 * jax.random.normal(k_g, (C_OUT,), dtype=jnp.float32)
    bn_beta = 0.1 * jax.random.normal(k_b, (C_OUT,), dtype=jnp.float32)
    bn_mean = 0.1 * jax.random.normal(k_m, (C_OUT,), dtype=jnp.float32)
    bn_var = jnp.abs(jax.random.normal(k_v, (C_OUT,), dtype=jnp.float32)) + 0.5

    out = basic_conv2d(x, conv_w, bn_gamma, bn_beta, bn_mean, bn_var,
                       stride=1, padding=1)
    out = jax.block_until_ready(out)

    ref = _reference(x, conv_w, bn_gamma, bn_beta, bn_mean, bn_var,
                     stride=1, padding=1)
    assert out.shape == (N, C_OUT, H, W), out.shape
    # bf16 matmul operands (f32 accumulation) -> allow a few e-2 absolute error.
    max_err = float(jnp.max(jnp.abs(out - ref)))
    assert max_err < 5e-2, max_err

    print("KERNEL_OK")
</pallas_src>

<mosaic_0001>
module attributes {stable_mosaic.version = 11 : i64} {
  func.func @_fused_conv_bn_relu_kernel(%arg0: i32, %arg1: i32, %arg2: i32, %arg3: memref<1x18x18x8xbf16, #tpu.memory_space<vmem>>, %arg4: memref<72x128xbf16, #tpu.memory_space<vmem>>, %arg5: memref<1x128xf32, #tpu.memory_space<vmem>>, %arg6: memref<1x256x128xf32, #tpu.memory_space<vmem>>) attributes {dimension_semantics = [#tpu.dimension_semantics<parallel>, #tpu.dimension_semantics<parallel>, #tpu.dimension_semantics<parallel>], iteration_bounds = array<i64: 2, 1, 1>, scalar_prefetch = 0 : i64, scratch_operands = 0 : i64, tpu.core_type = #tpu.core_type<tc>, window_params = [{transform_indices = @transform_0, window_bounds = array<i64: 1, 18, 18, 8>}, {transform_indices = @transform_1, window_bounds = array<i64: 72, 128>}, {transform_indices = @transform_2, window_bounds = array<i64: 1, 128>}, {transform_indices = @transform_3, window_bounds = array<i64: 1, 256, 128>}]} {
    %c16_i32 = arith.constant 16 : i32
    %0 = arith.muli %arg2, %c16_i32 : i32
    %cst = arith.constant 0.000000e+00 : f32
    %1 = vector.broadcast %cst : f32 to vector<256x128xf32>
    %c0_i32 = arith.constant 0 : i32
    %2 = arith.addi %0, %c0_i32 : i32
    %c0 = arith.constant 0 : index
    %3 = arith.index_cast %2 : i32 to index
    %c0_0 = arith.constant 0 : index
    %c0_1 = arith.constant 0 : index
    %4 = vector.load %arg3[%c0, %3, %c0_0, %c0_1] : memref<1x18x18x8xbf16, #tpu.memory_space<vmem>>, vector<1x16x16x8xbf16>
    %5 = vector.shape_cast %4 : vector<1x16x16x8xbf16> to vector<16x16x8xbf16>
    %6 = vector.shape_cast %5 : vector<16x16x8xbf16> to vector<256x8xbf16>
    %c0_2 = arith.constant 0 : index
    %c0_3 = arith.constant 0 : index
    %7 = vector.load %arg4[%c0_2, %c0_3] : memref<72x128xbf16, #tpu.memory_space<vmem>>, vector<8x128xbf16>
    %cst_4 = arith.constant dense<0.000000e+00> : vector<256x128xf32>
    %8 = tpu.matmul %6, %7, %cst_4 {dimension_numbers = #tpu.dot_dimension_numbers<[1], [0], [0], [1], [0, 0, 1, 1], [], []>} : vector<256x8xbf16>, vector<8x128xbf16>, vector<256x128xf32> -> vector<256x128xf32>
    %9 = arith.addf %1, %8 : vector<256x128xf32>
    %c0_i32_5 = arith.constant 0 : i32
    %10 = arith.addi %0, %c0_i32_5 : i32
    %c0_6 = arith.constant 0 : index
    %11 = arith.index_cast %10 : i32 to index
    %c1 = arith.constant 1 : index
    %c0_7 = arith.constant 0 : index
    %12 = vector.load %arg3[%c0_6, %11, %c1, %c0_7] : memref<1x18x18x8xbf16, #tpu.memory_space<vmem>>, vector<1x16x16x8xbf16>
    %13 = vector.shape_cast %12 : vector<1x16x16x8xbf16> to vector<16x16x8xbf16>
    %14 = vector.shape_cast %13 : vector<16x16x8xbf16> to vector<256x8xbf16>
    %c8 = arith.constant 8 : index
    %c0_8 = arith.constant 0 : index
    %15 = vector.load %arg4[%c8, %c0_8] : memref<72x128xbf16, #tpu.memory_space<vmem>>, vector<8x128xbf16>
    %cst_9 = arith.constant dense<0.000000e+00> : vector<256x128xf32>
    %16 = tpu.matmul %14, %15, %cst_9 {dimension_numbers = #tpu.dot_dimension_numbers<[1], [0], [0], [1], [0, 0, 1, 1], [], []>} : vector<256x8xbf16>, vector<8x128xbf16>, vector<256x128xf32> -> vector<256x128xf32>
    %17 = arith.addf %9, %16 : vector<256x128xf32>
    %c0_i32_10 = arith.constant 0 : i32
    %18 = arith.addi %0, %c0_i32_10 : i32
    %c0_11 = arith.constant 0 : index
    %19 = arith.index_cast %18 : i32 to index
    %c2 = arith.constant 2 : index
    %c0_12 = arith.constant 0 : index
    %20 = vector.load %arg3[%c0_11, %19, %c2, %c0_12] : memref<1x18x18x8xbf16, #tpu.memory_space<vmem>>, vector<1x16x16x8xbf16>
    %21 = vector.shape_cast %20 : vector<1x16x16x8xbf16> to vector<16x16x8xbf16>
    %22 = vector.shape_cast %21 : vector<16x16x8xbf16> to vector<256x8xbf16>
    %c16 = arith.constant 16 : index
    %c0_13 = arith.constant 0 : index
    %23 = vector.load %arg4[%c16, %c0_13] : memref<72x128xbf16, #tpu.memory_space<vmem>>, vector<8x128xbf16>
    %cst_14 = arith.constant dense<0.000000e+00> : vector<256x128xf32>
    %24 = tpu.matmul %22, %23, %cst_14 {dimension_numbers = #tpu.dot_dimension_numbers<[1], [0], [0], [1], [0, 0, 1, 1], [], []>} : vector<256x8xbf16>, vector<8x128xbf16>, vector<256x128xf32> -> vector<256x128xf32>
    %25 = arith.addf %17, %24 : vector<256x128xf32>
    %c1_i32 = arith.constant 1 : i32
    %26 = arith.addi %0, %c1_i32 : i32
    %c0_15 = arith.constant 0 : index
    %27 = arith.index_cast %26 : i32 to index
    %c0_16 = arith.constant 0 : index
    %c0_17 = arith.constant 0 : index
    %28 = vector.load %arg3[%c0_15, %27, %c0_16, %c0_17] : memref<1x18x18x8xbf16, #tpu.memory_space<vmem>>, vector<1x16x16x8xbf16>
    %29 = vector.shape_cast %28 : vector<1x16x16x8xbf16> to vector<16x16x8xbf16>
    %30 = vector.shape_cast %29 : vector<16x16x8xbf16> to vector<256x8xbf16>
    %c24 = arith.constant 24 : index
    %c0_18 = arith.constant 0 : index
    %31 = vector.load %arg4[%c24, %c0_18] : memref<72x128xbf16, #tpu.memory_space<vmem>>, vector<8x128xbf16>
    %cst_19 = arith.constant dense<0.000000e+00> : vector<256x128xf32>
    %32 = tpu.matmul %30, %31, %cst_19 {dimension_numbers = #tpu.dot_dimension_numbers<[1], [0], [0], [1], [0, 0, 1, 1], [], []>} : vector<256x8xbf16>, vector<8x128xbf16>, vector<256x128xf32> -> vector<256x128xf32>
    %33 = arith.addf %25, %32 : vector<256x128xf32>
    %c1_i32_20 = arith.constant 1 : i32
    %34 = arith.addi %0, %c1_i32_20 : i32
    %c0_21 = arith.constant 0 : index
    %35 = arith.index_cast %34 : i32 to index
    %c1_22 = arith.constant 1 : index
    %c0_23 = arith.constant 0 : index
    %36 = vector.load %arg3[%c0_21, %35, %c1_22, %c0_23] : memref<1x18x18x8xbf16, #tpu.memory_space<vmem>>, vector<1x16x16x8xbf16>
    %37 = vector.shape_cast %36 : vector<1x16x16x8xbf16> to vector<16x16x8xbf16>
    %38 = vector.shape_cast %37 : vector<16x16x8xbf16> to vector<256x8xbf16>
    %c32 = arith.constant 32 : index
    %c0_24 = arith.constant 0 : index
    %39 = vector.load %arg4[%c32, %c0_24] : memref<72x128xbf16, #tpu.memory_space<vmem>>, vector<8x128xbf16>
    %cst_25 = arith.constant dense<0.000000e+00> : vector<256x128xf32>
    %40 = tpu.matmul %38, %39, %cst_25 {dimension_numbers = #tpu.dot_dimension_numbers<[1], [0], [0], [1], [0, 0, 1, 1], [], []>} : vector<256x8xbf16>, vector<8x128xbf16>, vector<256x128xf32> -> vector<256x128xf32>
    %41 = arith.addf %33, %40 : vector<256x128xf32>
    %c1_i32_26 = arith.constant 1 : i32
    %42 = arith.addi %0, %c1_i32_26 : i32
    %c0_27 = arith.constant 0 : index
    %43 = arith.index_cast %42 : i32 to index
    %c2_28 = arith.constant 2 : index
    %c0_29 = arith.constant 0 : index
    %44 = vector.load %arg3[%c0_27, %43, %c2_28, %c0_29] : memref<1x18x18x8xbf16, #tpu.memory_space<vmem>>, vector<1x16x16x8xbf16>
    %45 = vector.shape_cast %44 : vector<1x16x16x8xbf16> to vector<16x16x8xbf16>
    %46 = vector.shape_cast %45 : vector<16x16x8xbf16> to vector<256x8xbf16>
    %c40 = arith.constant 40 : index
    %c0_30 = arith.constant 0 : index
    %47 = vector.load %arg4[%c40, %c0_30] : memref<72x128xbf16, #tpu.memory_space<vmem>>, vector<8x128xbf16>
    %cst_31 = arith.constant dense<0.000000e+00> : vector<256x128xf32>
    %48 = tpu.matmul %46, %47, %cst_31 {dimension_numbers = #tpu.dot_dimension_numbers<[1], [0], [0], [1], [0, 0, 1, 1], [], []>} : vector<256x8xbf16>, vector<8x128xbf16>, vector<256x128xf32> -> vector<256x128xf32>
    %49 = arith.addf %41, %48 : vector<256x128xf32>
    %c2_i32 = arith.constant 2 : i32
    %50 = arith.addi %0, %c2_i32 : i32
    %c0_32 = arith.constant 0 : index
    %51 = arith.index_cast %50 : i32 to index
    %c0_33 = arith.constant 0 : index
    %c0_34 = arith.constant 0 : index
    %52 = vector.load %arg3[%c0_32, %51, %c0_33, %c0_34] : memref<1x18x18x8xbf16, #tpu.memory_space<vmem>>, vector<1x16x16x8xbf16>
    %53 = vector.shape_cast %52 : vector<1x16x16x8xbf16> to vector<16x16x8xbf16>
    %54 = vector.shape_cast %53 : vector<16x16x8xbf16> to vector<256x8xbf16>
    %c48 = arith.constant 48 : index
    %c0_35 = arith.constant 0 : index
    %55 = vector.load %arg4[%c48, %c0_35] : memref<72x128xbf16, #tpu.memory_space<vmem>>, vector<8x128xbf16>
    %cst_36 = arith.constant dense<0.000000e+00> : vector<256x128xf32>
    %56 = tpu.matmul %54, %55, %cst_36 {dimension_numbers = #tpu.dot_dimension_numbers<[1], [0], [0], [1], [0, 0, 1, 1], [], []>} : vector<256x8xbf16>, vector<8x128xbf16>, vector<256x128xf32> -> vector<256x128xf32>
    %57 = arith.addf %49, %56 : vector<256x128xf32>
    %c2_i32_37 = arith.constant 2 : i32
    %58 = arith.addi %0, %c2_i32_37 : i32
    %c0_38 = arith.constant 0 : index
    %59 = arith.index_cast %58 : i32 to index
    %c1_39 = arith.constant 1 : index
    %c0_40 = arith.constant 0 : index
    %60 = vector.load %arg3[%c0_38, %59, %c1_39, %c0_40] : memref<1x18x18x8xbf16, #tpu.memory_space<vmem>>, vector<1x16x16x8xbf16>
    %61 = vector.shape_cast %60 : vector<1x16x16x8xbf16> to vector<16x16x8xbf16>
    %62 = vector.shape_cast %61 : vector<16x16x8xbf16> to vector<256x8xbf16>
    %c56 = arith.constant 56 : index
    %c0_41 = arith.constant 0 : index
    %63 = vector.load %arg4[%c56, %c0_41] : memref<72x128xbf16, #tpu.memory_space<vmem>>, vector<8x128xbf16>
    %cst_42 = arith.constant dense<0.000000e+00> : vector<256x128xf32>
    %64 = tpu.matmul %62, %63, %cst_42 {dimension_numbers = #tpu.dot_dimension_numbers<[1], [0], [0], [1], [0, 0, 1, 1], [], []>} : vector<256x8xbf16>, vector<8x128xbf16>, vector<256x128xf32> -> vector<256x128xf32>
    %65 = arith.addf %57, %64 : vector<256x128xf32>
    %c2_i32_43 = arith.constant 2 : i32
    %66 = arith.addi %0, %c2_i32_43 : i32
    %c0_44 = arith.constant 0 : index
    %67 = arith.index_cast %66 : i32 to index
    %c2_45 = arith.constant 2 : index
    %c0_46 = arith.constant 0 : index
    %68 = vector.load %arg3[%c0_44, %67, %c2_45, %c0_46] : memref<1x18x18x8xbf16, #tpu.memory_space<vmem>>, vector<1x16x16x8xbf16>
    %69 = vector.shape_cast %68 : vector<1x16x16x8xbf16> to vector<16x16x8xbf16>
    %70 = vector.shape_cast %69 : vector<16x16x8xbf16> to vector<256x8xbf16>
    %c64 = arith.constant 64 : index
    %c0_47 = arith.constant 0 : index
    %71 = vector.load %arg4[%c64, %c0_47] : memref<72x128xbf16, #tpu.memory_space<vmem>>, vector<8x128xbf16>
    %cst_48 = arith.constant dense<0.000000e+00> : vector<256x128xf32>
    %72 = tpu.matmul %70, %71, %cst_48 {dimension_numbers = #tpu.dot_dimension_numbers<[1], [0], [0], [1], [0, 0, 1, 1], [], []>} : vector<256x8xbf16>, vector<8x128xbf16>, vector<256x128xf32> -> vector<256x128xf32>
    %73 = arith.addf %65, %72 : vector<256x128xf32>
    %c0_49 = arith.constant 0 : index
    %c0_50 = arith.constant 0 : index
    %74 = vector.load %arg5[%c0_49, %c0_50] : memref<1x128xf32, #tpu.memory_space<vmem>>, vector<1x128xf32>
    %75 = vector.broadcast %74 : vector<1x128xf32> to vector<256x128xf32>
    %76 = arith.addf %73, %75 : vector<256x128xf32>
    %cst_51 = arith.constant 0.000000e+00 : f32
    %77 = vector.broadcast %cst_51 : f32 to vector<256x128xf32>
    %78 = arith.maximumf %76, %77 : vector<256x128xf32>
    %c0_52 = arith.constant 0 : index
    %c0_53 = arith.constant 0 : index
    %c0_54 = arith.constant 0 : index
    %79 = vector.load %arg6[%c0_52, %c0_53, %c0_54] : memref<1x256x128xf32, #tpu.memory_space<vmem>>, vector<1x256x128xf32>
    %80 = vector.shape_cast %79 : vector<1x256x128xf32> to vector<256x128xf32>
    %81 = vector.shape_cast %78 : vector<256x128xf32> to vector<1x256x128xf32>
    tpu.vector_store %arg6[%c0_52, %c0_53, %c0_54], %81 {strides = array<i32>} : memref<1x256x128xf32, #tpu.memory_space<vmem>>, vector<1x256x128xf32>,
    return
  }
  func.func @transform_0(%arg0: i32, %arg1: i32, %arg2: i32) -> (i32, i32, i32, i32) {
    %c0_i32 = arith.constant 0 : i32
    %c0_i32_0 = arith.constant 0 : i32
    %c0_i32_1 = arith.constant 0 : i32
    %c0_i32_2 = arith.constant 0 : i32
    return %arg0, %c0_i32, %c0_i32_0, %c0_i32_1 : i32, i32, i32, i32
  }
  func.func @transform_1(%arg0: i32, %arg1: i32, %arg2: i32) -> (i32, i32) {
    %c0_i32 = arith.constant 0 : i32
    %c0_i32_0 = arith.constant 0 : i32
    return %c0_i32, %arg1 : i32, i32
  }
  func.func @transform_2(%arg0: i32, %arg1: i32, %arg2: i32) -> (i32, i32) {
    %c0_i32 = arith.constant 0 : i32
    %c0_i32_0 = arith.constant 0 : i32
    return %c0_i32, %arg1 : i32, i32
  }
  func.func @transform_3(%arg0: i32, %arg1: i32, %arg2: i32) -> (i32, i32, i32) {
    %c0_i32 = arith.constant 0 : i32
    return %arg0, %arg2, %arg1 : i32, i32, i32
  }
}

</mosaic_0001>

<bundles_post_ra>
// kernel: basic_conv2d.1
= control target key start
LH: loop header
LB: loop body
LE: loop exit
PB: predicated region body
PF: predicated region fallthrough
CT: control target
= control target key end

     0   :  { %s6479_s12 = smov 0   ;;  %s6481_s13 = smov 0   ;;  %s8296_s0 = inlined_call_operand.vmem [shape: bf16[2,18,18,8], index: 0, kind: input, shape index: {}]   ;;  %s8297_s1 = inlined_call_operand.vmem [shape: bf16[72,128], index: 1, kind: input, shape index: {}]   ;;  %s8298_s2 = inlined_call_operand.vmem [shape: f32[1,128], index: 2, kind: input, shape index: {}]   ;;  %s8299_s3 = inlined_call_operand.vmem [shape: f32[2,256,128], index: 3, kind: output, shape index: {}]  }
   0x1   :  { %s6483_s14 = smov 0  }
   0x2 LB: > { %s32_s15 = sadd.s32 1, %s6453_s13  ;;  %p5042_p0 = scmp.ge.s32.totalorder %s6457_s14, 1  ;;  %s6457_s14 = sphi %s6483_s14, %s13_s14   ;;  %s6453_s13 = sphi %s6481_s13, %s8368_s13   ;;  %s6449_s12 = sphi %s6479_s12, %s8367_s12  }
   0x3   : > { %p34_p1 = scmp.ge.s32.totalorder %s32_s15, 2  ;;  %p177_p2 = scmp.lt.s32.totalorder %s6457_s14, 3 }
   0x5   : > { %s8370_s15 = smov (%p34_p1, %s32_s15), 0  ;;  %p178_p3 = pnand %p5042_p0, %p177_p2 }
   0x7   : > { %181 = sbr.rel (%p178_p3) target bundleno = 588 (0x24c), region = 32 }
   0xe   : > { %v681_v0 = vld [vmem:[%s8297_s1 + $0x4] sm:$0xf]  ;;  %vm779_vm0 = vcmask 1043456   ;;  %v2485_v1 = vld [vmem:[%s8297_s1 + $0x10] sm:$0xf]  ;;  %p215_p4 = scmp.lt.s32.totalorder %s6449_s12, 1 }
   0xf   : > { %6295 = vmatprep.subr.msk.bf16.mxu1 %vm779_vm0, %v681_v0  ;;  %6299 = vmatprep.subr.msk.bf16.mxu0 %vm779_vm0, %v2485_v1  ;;  %v781_v2 = vsel %vm779_vm0, %v681_v0, 0  ;;  %v6507_v3 = vsel %vm779_vm0, %v2485_v1, 0  ;;  %v277_v4 = vld [vmem:[%s8297_s1] sm:$0xf]  ;;  %v2954_v5 = vld [vmem:[%s8297_s1 + $0x14] sm:$0xf] }
  0x10   : > { %8313 = vst [vmem:[#allocation2_spill] sm:$0xff] %v6507_v3  ;;  %5732 = vmatpush3.bf16.msra.mxu1 %v781_v2  ;;  %5868 = vmatpush3.bf16.msra.mxu0 %v6507_v3  ;;  %s8372_s12 = smov (!%p215_p4, %s6449_s12), 1  ;;  %vm294_vm1 = vsmask.f32 3328  ;;  %vm295_vm2 = vsmask.f32 7440 }
  0x11   : > { %6296 = vmatprep.subr.msk.bf16.mxu1 %vm779_vm0, %v277_v4  ;;  %6301 = vmatprep.subr.msk.bf16.mxu0 %vm779_vm0, %v2954_v5  ;;  %s6305_s24 = smul.u32 216, %s8372_s12  ;;  %vm730_vm3 = vcmask 64512   ;;  %v6537_v17 = vsel %vm779_vm0, %v277_v4, 0  ;;  %v6543_v26 = vld [vmem:[%s8297_s1 + $0x18] sm:$0xf]  ;;  %vm6550_vm4 = vmor %vm294_vm1, %vm295_vm2  ;;  %v6556_v37 = vsel %vm779_vm0, %v2954_v5, 0 }
  0x12   : > { %v6560_v41 = vsel %vm779_vm0, %v6543_v26, 0  ;;  %vm1284_vm5 = vcmask 1042432   ;;  %vm1285_vm6 = vcmask 1046532   ;;  %s5577_s21 = sshll.u32 %s8372_s12, 8 }
  0x13   : > { %s6524_s27 = scalar_lea.vmem %s8296_s0, %s6305_s24  ;;  %vm6776_vm7 = vmor %vm1284_vm5, %vm1285_vm6  ;;  %s8218_s24 = scalar_lea.vmem %s8299_s3, %s5577_s21 }
  0x14   : > { %v245_v6 = vld [vmem:[%s6524_s27] sm:$0xf]  ;;  %v246_v7 = vld [vmem:[%s6524_s27 + $0x4] sm:$0xf]  ;;  %v278_v8 = vld [vmem:[%s6524_s27 + $0x8] sm:$0x1] }
  0x15   : > { %v298_v9 = vshrl.u32 %v245_v6, 16  ;;  %v301_v10 = vshll.u32 %v245_v6, 16  ;;  %v307_v11 = vshll.u32 %v246_v7, 16  ;;  %v311_v12 = vshrl.u32 %v246_v7, 16  ;;  %v5222_v13 = vld [vmem:[%s6524_s27 + $0xc] sm:$0xf] }
  0x16   : > { %v317_v14 = vshll.u32 %v278_v8, 16  ;;  %v6531_v15 = vld [vmem:[%s6524_s27 + $0x10] sm:$0xf]  ;;  %v6534_v16 = vld [vmem:[%s6524_s27 + $0x14] sm:$0x1]  ;;  %v2102_v23 = vshrl.u32 %v5222_v13, 16 }
  0x17   : > { %v300_v18 = vrot.slane %v298_v9, 4  ;;  %v303_v19 = vrot.slane %v301_v10, 5  ;;  %v309_v20 = vrot.slane %v307_v11, 5  ;;  %v313_v21 = vrot.slane %v311_v12, 4  ;;  %v247_v31 = vld [vmem:[%s6524_s27 + $0xc] sm:$0xf] }
  0x18   : > { %v319_v22 = vrot.slane %v317_v14, 5  ;;  %v2105_v24 = vshll.u32 %v5222_v13, 16  ;;  %v2111_v25 = vshll.u32 %v6531_v15, 16  ;;  %v2115_v29 = vshrl.u32 %v6531_v15, 16  ;;  %v248_v36 = vld [vmem:[%s6524_s27 + $0x10] sm:$0xf] }
  0x19   : > { %v304_v27 = vor.u32 %v303_v19, %v300_v18  ;;  %v314_v28 = vor.u32 %v313_v21, %v309_v20  ;;  %v2121_v30 = vshll.u32 %v6534_v16, 16  ;;  %v2104_v33 = vrot.slane %v2102_v23, 4  ;;  %v279_v44 = vld [vmem:[%s6524_s27 + $0x14] sm:$0x1]  ;;  %v5225_v55 = vld [vmem:[%s6524_s27 + $0x18] sm:$0xf] }
  0x1a   : > { %v2107_v34 = vrot.slane %v2105_v24, 5  ;;  %v2113_v35 = vrot.slane %v2111_v25, 5  ;;  %v2117_v40 = vrot.slane %v2115_v29, 4  ;;  %v322_v45 = vshrl.u32 %v247_v31, 16  ;;  %v6569_v60 = vld [vmem:[%s6524_s27 + $0x1c] sm:$0xf] }
  0x1b   : > { %v305_v38 = vrot.slane %v304_v27, 4  ;;  %v315_v39 = vrot.slane %v314_v28, 4  ;;  %v2123_v43 = vrot.slane %v2121_v30, 5  ;;  %v325_v46 = vshll.u32 %v247_v31, 16  ;;  %v6577_v1 = vld [vmem:[%s6524_s27 + $0x20] sm:$0x1] }
  0x1c   : > { %v2108_v42 = vor.u32 %v2107_v34, %v2104_v33  ;;  %v2118_v49 = vor.u32 %v2117_v40, %v2113_v35  ;;  %v331_v50 = vshll.u32 %v248_v36, 16  ;;  %v324_v53 = vrot.slane %v322_v45, 4  ;;  %v249_v18 = vld [vmem:[%s6524_s27 + $0x18] sm:$0xf]  ;;  %v250_v23 = vld [vmem:[%s6524_s27 + $0x1c] sm:$0xf] }
  0x1d   : > { %v310_v47 = vsel %vm6550_vm4, %v305_v38, %v309_v20  ;;  %v320_v48 = vsel %vm6550_vm4, %v315_v39, %v319_v22  ;;  %v327_v54 = vrot.slane %v325_v46, 5  ;;  %v335_v58 = vshrl.u32 %v248_v36, 16  ;;  %v280_v31 = vld [vmem:[%s6524_s27 + $0x20] sm:$0x1]  ;;  %v5228_v40 = vld [vmem:[%s6524_s27 + $0x24] sm:$0xf] }
  0x1e   : > { %v5046_v51 = vcombine.low %v310_v47, %v320_v48  ;;  %v2109_v52 = vrot.slane %v2108_v42, 4  ;;  %v2119_v56 = vrot.slane %v2118_v49, 4  ;;  %v333_v57 = vrot.slane %v331_v50, 5  ;;  %v6600_v46 = vld [vmem:[%s6524_s27 + $0x28] sm:$0xf] }
  0x1f   : > { %v341_v59 = vshll.u32 %v279_v44, 16  ;;  %v2844_v62 = vrot.slane %v6531_v15, 5  ;;  %v2847_v63 = vrot.slane %v6534_v16, 5  ;;  %v328_v0 = vor.u32 %v327_v54, %v324_v53  ;;  %v6609_v54 = vld [vmem:[%s6524_s27 + $0x2c] sm:$0x1] }
  0x20   : > { %5733 = vmatprep.mubr.msk.bf16.mxu1 %vm730_vm3, %v5046_v51  ;;  %v2114_v61 = vsel %vm6550_vm4, %v2109_v52, %v2113_v35  ;;  %v2124_v2 = vsel %vm6550_vm4, %v2119_v56, %v2123_v43  ;;  %v337_v4 = vrot.slane %v335_v58, 4  ;;  %v2126_v6 = vshrl.u32 %v5225_v55, 16  ;;  %v1399_v51 = vld [vmem:[%s8297_s1 + $0x8] sm:$0xf]  ;;  %v6809_v16 = vld [vmem:[%s6524_s27 + $0x7c] sm:$0xf] }
  0x21   : > { %v343_v5 = vrot.slane %v341_v59, 5  ;;  %v5270_v7 = vcombine.low %v2114_v61, %v2124_v2  ;;  %v329_v8 = vrot.slane %v328_v0, 4  ;;  %v2129_v9 = vshll.u32 %v5225_v55, 16  ;;  %v251_v0 = vld [vmem:[%s6524_s27 + $0x24] sm:$0xf] }
  0x22   : > { %v2135_v10 = vshll.u32 %v6569_v60, 16  ;;  %v338_v11 = vor.u32 %v337_v4, %v333_v57  ;;  %v2128_v12 = vrot.slane %v2126_v6, 4  ;;  %v2139_v13 = vshrl.u32 %v6569_v60, 16 }
  0x23   : > { %v2145_v14 = vshll.u32 %v6577_v1, 16  ;;  %5869 = vmatprep.mubr.msk.bf16.mxu0 %vm730_vm3, %v5270_v7  ;;  %v334_v19 = vsel %vm6550_vm4, %v329_v8, %v333_v57  ;;  %v2131_v20 = vrot.slane %v2129_v9, 5  ;;  %v2851_v22 = vrot.slane %v6569_v60, 5  ;;  %v252_v7 = vld [vmem:[%s6524_s27 + $0x28] sm:$0xf] }
  0x24   : > { %v2137_v21 = vrot.slane %v2135_v10, 5  ;;  %v339_v24 = vrot.slane %v338_v11, 4  ;;  %v2141_v25 = vrot.slane %v2139_v13, 4  ;;  %v2854_v28 = vrot.slane %v6577_v1, 5  ;;  %v281_v13 = vld [vmem:[%s6524_s27 + $0x2c] sm:$0x1] }
  0x25   : > { %v2147_v27 = vrot.slane %v2145_v14, 5  ;;  %v2132_v29 = vor.u32 %v2131_v20, %v2128_v12  ;;  %v6593_v30 = vrot.slane %v2851_v22, 4  ;;  %v346_v33 = vshrl.u32 %v249_v18, 16 }
  0x26   : > { %v349_v34 = vshll.u32 %v249_v18, 16  ;;  %v344_v35 = vsel %vm6550_vm4, %v339_v24, %v343_v5  ;;  %v2142_v36 = vor.u32 %v2141_v25, %v2137_v21  ;;  %v355_v38 = vshll.u32 %v250_v23, 16  ;;  %v5231_v24 = vld [vmem:[%s6524_s27 + $0x30] sm:$0xf] }
  0x27   : > { %v359_v39 = vshrl.u32 %v250_v23, 16  ;;  %v5047_v42 = vcombine.low %v334_v19, %v344_v35  ;;  %v2133_v43 = vrot.slane %v2132_v29, 4  ;;  %v348_v44 = vrot.slane %v346_v33, 4  ;;  %v6629_v33 = vld [vmem:[%s6524_s27 + $0x34] sm:$0xf] }
  0x28   : > { %v351_v45 = vrot.slane %v349_v34, 5  ;;  %v2143_v47 = vrot.slane %v2142_v36, 4  ;;  %v357_v48 = vrot.slane %v355_v38, 5  ;;  %v365_v50 = vshll.u32 %v280_v31, 16 }
  0x29   : > { %v361_v49 = vrot.slane %v359_v39, 4  ;;  %5734 = vmatmul.mubr.msk.bf16.vlgmr.msra.gmra.mrb[0].mxu1 %vm730_vm3, %v5047_v42  ;;  %v2138_v52 = vsel %vm6550_vm4, %v2133_v43, %v2137_v21  ;;  %v2150_v55 = vshrl.u32 %v5228_v40, 16  ;;  %v2153_v56 = vshll.u32 %v5228_v40, 16  ;;  %v6637_v40 = vld [vmem:[%s6524_s27 + $0x38] sm:$0x1] }
  0x2a   : > { %v352_v53 = vor.u32 %v351_v45, %v348_v44  ;;  %5766 = vmatpush3.bf16.msra.mxu1 %v6537_v17  ;;  %v2148_v57 = vsel %vm6550_vm4, %v2143_v47, %v2147_v27  ;;  %v367_v59 = vrot.slane %v365_v50, 5  ;;  %v2159_v61 = vshll.u32 %v6600_v46, 16 }
  0x2b   : > { %v362_v58 = vor.u32 %v361_v49, %v357_v48  ;;  %v5271_v2 = vcombine.low %v2138_v52, %v2148_v57  ;;  %v2152_v5 = vrot.slane %v2150_v55, 4  ;;  %v2155_v6 = vrot.slane %v2153_v56, 5  ;;  %6297 = vmatprep.subr.msk.bf16.mxu1 %vm779_vm0, %v1399_v51  ;;  %v253_v52 = vld [vmem:[%s6524_s27 + $0x30] sm:$0xf] }
  0x2c   : > { %v353_v4 = vrot.slane %v352_v53, 4  ;;  %v2161_v9 = vrot.slane %v2159_v61, 5  ;;  %v2163_v17 = vshrl.u32 %v6600_v46, 16  ;;  %v2169_v10 = vshll.u32 %v6609_v54, 16 }
  0x2d   : > { %v363_v8 = vrot.slane %v362_v58, 4  ;;  %5870 = vmatmul.mubr.msk.bf16.vlgmr.msra.gmra.mrb[0].mxu0 %vm730_vm3, %v5271_v2  ;;  %v2156_v12 = vor.u32 %v2155_v6, %v2152_v5  ;;  %v370_v14 = vshrl.u32 %v251_v0, 16  ;;  %v373_v18 = vshll.u32 %v251_v0, 16  ;;  %v254_v58 = vld [vmem:[%s6524_s27 + $0x34] sm:$0xf] }
  0x2e   : > { %v358_v11 = vsel %vm6550_vm4, %v353_v4, %v357_v48  ;;  %5902 = vmatpush3.bf16.msra.mxu0 %v6556_v37  ;;  %v2165_v20 = vrot.slane %v2163_v17, 4  ;;  %v2171_v21 = vrot.slane %v2169_v10, 5  ;;  %v379_v23 = vshll.u32 %v252_v7, 16  ;;  %v282_v4 = vld [vmem:[%s6524_s27 + $0x38] sm:$0x1] }
  0x2f   : > { %v368_v19 = vsel %vm6550_vm4, %v363_v8, %v367_v59  ;;  %v2157_v27 = vrot.slane %v2156_v12, 4  ;;  %v372_v29 = vrot.slane %v370_v14, 4  ;;  %v375_v31 = vrot.slane %v373_v18, 5  ;;  %6302 = vmatprep.subr.msk.bf16.mxu0 %vm779_vm0, %v6543_v26  ;;  %v5234_v12 = vld [vmem:[%s6524_s27 + $0x3c] sm:$0xf] }
  0x30   : > { %v5048_v25 = vcombine.low %v358_v11, %v368_v19  ;;  %v2166_v34 = vor.u32 %v2165_v20, %v2161_v9  ;;  %v381_v35 = vrot.slane %v379_v23, 5  ;;  %v383_v37 = vshrl.u32 %v252_v7, 16  ;;  %v6654_v20 = vld [vmem:[%s6524_s27 + $0x40] sm:$0xf] }
  0x31   : > { %v389_v36 = vshll.u32 %v281_v13, 16  ;;  %v2162_v38 = vsel %vm6550_vm4, %v2157_v27, %v2161_v9  ;;  %v376_v39 = vor.u32 %v375_v31, %v372_v29  ;;  %v2174_v42 = vshrl.u32 %v5231_v24, 16 }
  0x32   : > { %5737 = vmatprep.mubr.msk.bf16.mxu1 %vm730_vm3, %v5048_v25  ;;  %v2177_v43 = vshll.u32 %v5231_v24, 16  ;;  %v2167_v44 = vrot.slane %v2166_v34, 4  ;;  %v385_v45 = vrot.slane %v383_v37, 4  ;;  %v2183_v26 = vshll.u32 %v6629_v33, 16  ;;  %v6659_v34 = vld [vmem:[%s6524_s27 + $0x44] sm:$0x1] }
  0x33   : > { %v391_v47 = vrot.slane %v389_v36, 5  ;;  %v377_v48 = vrot.slane %v376_v39, 4  ;;  %v2176_v49 = vrot.slane %v2174_v42, 4  ;;  %v2187_v51 = vshrl.u32 %v6629_v33, 16  ;;  %v255_v42 = vld [vmem:[%s6524_s27 + $0x3c] sm:$0xf] }
  0x34   : > { %v2179_v50 = vrot.slane %v2177_v43, 5  ;;  %v2172_v53 = vsel %vm6550_vm4, %v2167_v44, %v2171_v21  ;;  %v386_v55 = vor.u32 %v385_v45, %v381_v35  ;;  %v2185_v56 = vrot.slane %v2183_v26, 5  ;;  %v256_v26 = vld [vmem:[%s6524_s27 + $0x40] sm:$0xf] }
  0x35   : > { %v2193_v57 = vshll.u32 %v6637_v40, 16  ;;  %v5272_v59 = vcombine.low %v2162_v38, %v2172_v53  ;;  %v382_v61 = vsel %vm6550_vm4, %v377_v48, %v381_v35  ;;  %v2189_v2 = vrot.slane %v2187_v51, 4 }
  0x36   : > { %v2180_v0 = vor.u32 %v2179_v50, %v2176_v49  ;;  %v387_v5 = vrot.slane %v386_v55, 4  ;;  %v394_v7 = vshrl.u32 %v253_v52, 16  ;;  %v397_v8 = vshll.u32 %v253_v52, 16 }
  0x37   : > { %v2195_v6 = vrot.slane %v2193_v57, 5  ;;  %5873 = vmatprep.mubr.msk.bf16.mxu0 %vm730_vm3, %v5272_v59  ;;  %v2190_v17 = vor.u32 %v2189_v2, %v2185_v56  ;;  %v403_v10 = vshll.u32 %v254_v58, 16  ;;  %v407_v11 = vshrl.u32 %v254_v58, 16  ;;  %v5237_v2 = vld [vmem:[%s6524_s27 + $0x48] sm:$0xf] }
  0x38   : > { %v2181_v9 = vrot.slane %v2180_v0, 4  ;;  %v392_v13 = vsel %vm6550_vm4, %v387_v5, %v391_v47  ;;  %v396_v14 = vrot.slane %v394_v7, 4  ;;  %v399_v18 = vrot.slane %v397_v8, 5  ;;  %v6677_v8 = vld [vmem:[%s6524_s27 + $0x4c] sm:$0xf] }
  0x39   : > { %v413_v19 = vshll.u32 %v282_v4, 16  ;;  %v5049_v21 = vcombine.low %v382_v61, %v392_v13  ;;  %v2191_v24 = vrot.slane %v2190_v17, 4  ;;  %v405_v25 = vrot.slane %v403_v10, 5  ;;  %v283_v61 = vld [vmem:[%s6524_s27 + $0x44] sm:$0x1] }
  0x3a   : > { %v2186_v23 = vsel %vm6550_vm4, %v2181_v9, %v2185_v56  ;;  %v400_v27 = vor.u32 %v399_v18, %v396_v14  ;;  %v409_v29 = vrot.slane %v407_v11, 4  ;;  %v2198_v35 = vshrl.u32 %v5234_v12, 16 }
  0x3b   : > { %v415_v31 = vrot.slane %v413_v19, 5  ;;  %5738 = vmatmul.mubr.msk.bf16.gmra.mrb[4].mxu1 %vm730_vm3, %v5049_v21  ;;  %v2196_v37 = vsel %vm6550_vm4, %v2191_v24, %v2195_v6  ;;  %v2201_v36 = vshll.u32 %v5234_v12, 16  ;;  %v2207_v38 = vshll.u32 %v6654_v20, 16 }
  0x3c   : > { %v2211_v39 = vshrl.u32 %v6654_v20, 16  ;;  %v5273_v43 = vcombine.low %v2186_v23, %v2196_v37  ;;  %v401_v44 = vrot.slane %v400_v27, 4  ;;  %v410_v45 = vor.u32 %v409_v29, %v405_v25  ;;  %v6685_v23 = vld [vmem:[%s6524_s27 + $0x50] sm:$0x1]  ;;  %v6689_v27 = vld [vmem:[%s6524_s27 + $0x48] sm:$0xf] }
  0x3d   : > { %v2200_v47 = vrot.slane %v2198_v35, 4  ;;  %v2203_v48 = vrot.slane %v2201_v36, 5  ;;  %v2209_v49 = vrot.slane %v2207_v38, 5  ;;  %v2217_v51 = vshll.u32 %v6659_v34, 16  ;;  %v6692_v36 = vld [vmem:[%s6524_s27 + $0x4c] sm:$0xf] }
  0x3e   : > { %v2213_v50 = vrot.slane %v2211_v39, 4  ;;  %5874 = vmatmul.mubr.msk.bf16.gmra.mrb[4].mxu0 %vm730_vm3, %v5273_v43  ;;  %v406_v52 = vsel %vm6550_vm4, %v401_v44, %v405_v25  ;;  %v411_v53 = vrot.slane %v410_v45, 4  ;;  %v418_v55 = vshrl.u32 %v255_v42, 16 }
  0x3f   : > { %v421_v56 = vshll.u32 %v255_v42, 16  ;;  %v2204_v57 = vor.u32 %v2203_v48, %v2200_v47  ;;  %v2219_v59 = vrot.slane %v2217_v51, 5  ;;  %v427_v0 = vshll.u32 %v256_v26, 16 }
  0x40   : > { %v2214_v58 = vor.u32 %v2213_v50, %v2209_v49  ;;  %v416_v4 = vsel %vm6550_vm4, %v411_v53, %v415_v31  ;;  %v420_v5 = vrot.slane %v418_v55, 4  ;;  %v431_v7 = vshrl.u32 %v256_v26, 16  ;;  %v284_v26 = vld [vmem:[%s6524_s27 + $0x50] sm:$0x1]  ;;  %v5240_v53 = vld [vmem:[%s6524_s27 + $0x54] sm:$0xf] }
  0x41   : > { %v423_v6 = vrot.slane %v421_v56, 5  ;;  %v5050_v9 = vcombine.low %v406_v52, %v416_v4  ;;  %v2205_v17 = vrot.slane %v2204_v57, 4  ;;  %v429_v11 = vrot.slane %v427_v0, 5  ;;  %v6708_v4 = vld [vmem:[%s6524_s27 + $0x58] sm:$0xf] }
  0x42   : > { %v2215_v10 = vrot.slane %v2214_v58, 4  ;;  %v433_v13 = vrot.slane %v431_v7, 4  ;;  %v437_v14 = vshll.u32 %v283_v61, 16  ;;  %v2222_v18 = vshrl.u32 %v5237_v2, 16 }
  0x43   : > { %v424_v12 = vor.u32 %v423_v6, %v420_v5  ;;  %5741 = vmatprep.mubr.msk.bf16.mxu1 %vm730_vm3, %v5050_v9  ;;  %v2210_v19 = vsel %vm6550_vm4, %v2205_v17, %v2209_v49  ;;  %v2225_v24 = vshll.u32 %v5237_v2, 16  ;;  %v2231_v25 = vshll.u32 %v6677_v8, 16 }
  0x44   : > { %v2220_v21 = vsel %vm6550_vm4, %v2215_v10, %v2219_v59  ;;  %v434_v35 = vor.u32 %v433_v13, %v429_v11  ;;  %v439_v37 = vrot.slane %v437_v14, 5  ;;  %v2224_v38 = vrot.slane %v2222_v18, 4 }
  0x45   : > { %v5274_v29 = vcombine.low %v2210_v19, %v2220_v21  ;;  %v425_v31 = vrot.slane %v424_v12, 4  ;;  %v2227_v39 = vrot.slane %v2225_v24, 5  ;;  %v2233_v42 = vrot.slane %v2231_v25, 5  ;;  %v6714_v12 = vld [vmem:[%s6524_s27 + $0x5c] sm:$0x1] }
  0x46   : > { %v2235_v43 = vshrl.u32 %v6677_v8, 16  ;;  %v435_v45 = vrot.slane %v434_v35, 4  ;;  %v2241_v47 = vshll.u32 %v6685_v23, 16  ;;  %v442_v48 = vshrl.u32 %v6689_v27, 16  ;;  %v6718_v24 = vld [vmem:[%s6524_s27 + $0x54] sm:$0xf] }
  0x47   : > { %5877 = vmatprep.mubr.msk.bf16.mxu0 %vm730_vm3, %v5274_v29  ;;  %v430_v44 = vsel %vm6550_vm4, %v425_v31, %v429_v11  ;;  %v2228_v49 = vor.u32 %v2227_v39, %v2224_v38  ;;  %v445_v51 = vshll.u32 %v6689_v27, 16  ;;  %v451_v52 = vshll.u32 %v6692_v36, 16 }
  0x48   : > { %v2237_v50 = vrot.slane %v2235_v43, 4  ;;  %v440_v55 = vsel %vm6550_vm4, %v435_v45, %v439_v37  ;;  %v2243_v56 = vrot.slane %v2241_v47, 5  ;;  %v444_v57 = vrot.slane %v442_v48, 4  ;;  %v6724_v37 = vld [vmem:[%s6524_s27 + $0x58] sm:$0xf] }
  0x49   : > { %v455_v58 = vshrl.u32 %v6692_v36, 16  ;;  %v5051_v59 = vcombine.low %v430_v44, %v440_v55  ;;  %v2229_v61 = vrot.slane %v2228_v49, 4  ;;  %v447_v2 = vrot.slane %v445_v51, 5 }
  0x4a   : > { %v2238_v0 = vor.u32 %v2237_v50, %v2233_v42  ;;  %v453_v5 = vrot.slane %v451_v52, 5  ;;  %v461_v7 = vshll.u32 %v284_v26, 16  ;;  %v2246_v9 = vshrl.u32 %v5240_v53, 16  ;;  %v285_v26 = vld [vmem:[%s6524_s27 + $0x5c] sm:$0x1] }
  0x4b   : > { %v457_v6 = vrot.slane %v455_v58, 4  ;;  %5742 = vmatmul.mubr.msk.bf16.gmra.mrb[8].mxu1 %vm730_vm3, %v5051_v59  ;;  %v2234_v17 = vsel %vm6550_vm4, %v2229_v61, %v2233_v42  ;;  %v448_v11 = vor.u32 %v447_v2, %v444_v57  ;;  %v2249_v13 = vshll.u32 %v5240_v53, 16  ;;  %v5243_v53 = vld [vmem:[%s6524_s27 + $0x60] sm:$0xf]  ;;  %v6738_v59 = vld [vmem:[%s6524_s27 + $0x64] sm:$0xf] }
  0x4c   : > { %v2239_v10 = vrot.slane %v2238_v0, 4  ;;  %v463_v18 = vrot.slane %v461_v7, 5  ;;  %v2248_v19 = vrot.slane %v2246_v9, 4  ;;  %v2255_v21 = vshll.u32 %v6708_v4, 16  ;;  %v6745_v9 = vld [vmem:[%s6524_s27 + $0x68] sm:$0x1] }
  0x4d   : > { %v458_v14 = vor.u32 %v457_v6, %v453_v5  ;;  %v449_v29 = vrot.slane %v448_v11, 4  ;;  %v2251_v31 = vrot.slane %v2249_v13, 5  ;;  %v2259_v35 = vshrl.u32 %v6708_v4, 16 }
  0x4e   : > { %v2244_v25 = vsel %vm6550_vm4, %v2239_v10, %v2243_v56  ;;  %v2257_v42 = vrot.slane %v2255_v21, 5  ;;  %v2265_v43 = vshll.u32 %v6714_v12, 16  ;;  %v466_v48 = vshrl.u32 %v6718_v24, 16 }
  0x4f   : > { %v5275_v38 = vcombine.low %v2234_v17, %v2244_v25  ;;  %v459_v39 = vrot.slane %v458_v14, 4  ;;  %v454_v44 = vsel %vm6550_vm4, %v449_v29, %v453_v5  ;;  %v2252_v45 = vor.u32 %v2251_v31, %v2248_v19  ;;  %v6749_v19 = vld [vmem:[%s6524_s27 + $0x60] sm:$0xf] }
  0x50   : > { %v2261_v47 = vrot.slane %v2259_v35, 4  ;;  %v2267_v50 = vrot.slane %v2265_v43, 5  ;;  %v469_v51 = vshll.u32 %v6718_v24, 16  ;;  %v475_v52 = vshll.u32 %v6724_v37, 16  ;;  %v6755_v35 = vld [vmem:[%s6524_s27 + $0x64] sm:$0xf] }
  0x51   : > { %5878 = vmatmul.mubr.msk.bf16.gmra.mrb[8].mxu0 %vm730_vm3, %v5275_v38  ;;  %v464_v49 = vsel %vm6550_vm4, %v459_v39, %v463_v18  ;;  %v2253_v56 = vrot.slane %v2252_v45, 4  ;;  %v468_v58 = vrot.slane %v466_v48, 4  ;;  %v479_v2 = vshrl.u32 %v6724_v37, 16 }
  0x52   : > { %v5052_v55 = vcombine.low %v454_v44, %v464_v49  ;;  %v2262_v57 = vor.u32 %v2261_v47, %v2257_v42  ;;  %v471_v61 = vrot.slane %v469_v51, 5  ;;  %v477_v0 = vrot.slane %v475_v52, 5 }
  0x53   : > { %v485_v5 = vshll.u32 %v285_v26, 16  ;;  %v2258_v6 = vsel %vm6550_vm4, %v2253_v56, %v2257_v42  ;;  %v2270_v17 = vshrl.u32 %v5243_v53, 16  ;;  %v2273_v10 = vshll.u32 %v5243_v53, 16 }
  0x54   : > { %5745 = vmatprep.mubr.msk.bf16.mxu1 %vm730_vm3, %v5052_v55  ;;  %v2263_v7 = vrot.slane %v2262_v57, 4  ;;  %v472_v11 = vor.u32 %v471_v61, %v468_v58  ;;  %v481_v13 = vrot.slane %v479_v2, 4  ;;  %v2279_v18 = vshll.u32 %v6738_v59, 16  ;;  %v5302_v58 = vld [vmem:[%s6524_s27 + $0xc] sm:$0xe] }
  0x55   : > { %v487_v14 = vrot.slane %v485_v5, 5  ;;  %v2272_v25 = vrot.slane %v2270_v17, 4  ;;  %v2275_v29 = vrot.slane %v2273_v10, 5  ;;  %v2283_v31 = vshrl.u32 %v6738_v59, 16 }
  0x56   : > { %v2268_v21 = vsel %vm6550_vm4, %v2263_v7, %v2267_v50  ;;  %v473_v39 = vrot.slane %v472_v11, 4  ;;  %v482_v42 = vor.u32 %v481_v13, %v477_v0  ;;  %v2281_v43 = vrot.slane %v2279_v18, 5  ;;  %v286_v50 = vld [vmem:[%s6524_s27 + $0x68] sm:$0x1] }
  0x57   : > { %v5276_v38 = vcombine.low %v2258_v6, %v2268_v21  ;;  %v2276_v44 = vor.u32 %v2275_v29, %v2272_v25  ;;  %v2285_v45 = vrot.slane %v2283_v31, 4  ;;  %v2289_v47 = vshll.u32 %v6745_v9, 16  ;;  %v6783_v29 = vld [vmem:[%s6524_s27 + $0x70] sm:$0xf] }
  0x58   : > { %v490_v26 = vshrl.u32 %v6749_v19, 16  ;;  %v478_v48 = vsel %vm6550_vm4, %v473_v39, %v477_v0  ;;  %v483_v49 = vrot.slane %v482_v42, 4  ;;  %v493_v51 = vshll.u32 %v6749_v19, 16  ;;  %v6770_v0 = vld [vmem:[%s6524_s27 + $0x6c] sm:$0xf] }
  0x59   : > { %5881 = vmatprep.mubr.msk.bf16.mxu0 %vm730_vm3, %v5276_v38  ;;  %v499_v52 = vshll.u32 %v6755_v35, 16  ;;  %v2277_v53 = vrot.slane %v2276_v44, 4  ;;  %v2286_v55 = vor.u32 %v2285_v45, %v2281_v43  ;;  %v2291_v56 = vrot.slane %v2289_v47, 5 }
  0x5a   : > { %v492_v57 = vrot.slane %v490_v26, 4  ;;  %v488_v61 = vsel %vm6550_vm4, %v483_v49, %v487_v14  ;;  %v495_v2 = vrot.slane %v493_v51, 5  ;;  %v503_v6 = vshrl.u32 %v6755_v35, 16  ;;  %v287_v26 = vld [vmem:[%s6524_s27 + $0x74] sm:$0x1] }
  0x5b   : > { %v501_v5 = vrot.slane %v499_v52, 5  ;;  %v5053_v7 = vcombine.low %v478_v48, %v488_v61  ;;  %v2282_v17 = vsel %vm6550_vm4, %v2277_v53, %v2281_v43  ;;  %v2287_v10 = vrot.slane %v2286_v55, 4  ;;  %v5303_v48 = vld [vmem:[%s6524_s27 + $0x18] sm:$0xe] }
  0x5c   : > { %v509_v11 = vshll.u32 %v286_v50, 16  ;;  %v496_v14 = vor.u32 %v495_v2, %v492_v57  ;;  %v505_v18 = vrot.slane %v503_v6, 4  ;;  %v5318_v21 = vrot.slane %v5302_v58, 9  ;;  %v6802_v53 = vld [vmem:[%s6524_s27 + $0x78] sm:$0xf] }
  0x5d   : > { %v2846_v25 = vrot.slane %v2844_v62, 4  ;;  %5746 = vmatmul.mubr.msk.bf16.gmra.mrb[12].mxu1 %vm730_vm3, %v5053_v7  ;;  %v2292_v31 = vsel %vm6550_vm4, %v2287_v10, %v2291_v56  ;;  %v514_v39 = vshrl.u32 %v6770_v0, 16  ;;  %v517_v42 = vshll.u32 %v6770_v0, 16  ;;  %v288_v57 = vld [vmem:[%s6524_s27 + $0x80] sm:$0x1] }
  0x5e   : > { %v511_v38 = vrot.slane %v509_v11, 5  ;;  %v5277_v43 = vcombine.low %v2282_v17, %v2292_v31  ;;  %v497_v44 = vrot.slane %v496_v14, 4  ;;  %v506_v45 = vor.u32 %v505_v18, %v501_v5  ;;  %v5304_v10 = vld [vmem:[%s6524_s27 + $0x24] sm:$0xe] }
  0x5f   : > { %v2845_v47 = vsel %vm6776_vm7, %v5318_v21, %v2844_v62  ;;  %v2848_v49 = vsel %vm6776_vm7, %v2846_v25, %v2847_v63  ;;  %v516_v50 = vrot.slane %v514_v39, 4  ;;  %v519_v51 = vrot.slane %v517_v42, 5  ;;  %v6828_v39 = vld [vmem:[%s6524_s27 + $0x84] sm:$0xf] }
  0x60   : > { %v523_v52 = vshll.u32 %v6783_v29, 16  ;;  %5882 = vmatmul.mubr.msk.bf16.gmra.mrb[12].mxu0 %vm730_vm3, %v5277_v43  ;;  %v502_v15 = vsel %vm6550_vm4, %v497_v44, %v501_v5  ;;  %v507_v62 = vrot.slane %v506_v45, 4  ;;  %v5334_v55 = vcombine.low %v2845_v47, %v2848_v49  ;;  %v6836_v43 = vld [vmem:[%s6524_s27 + $0x88] sm:$0xf] }
  0x61   : > { %v527_v56 = vshrl.u32 %v6783_v29, 16  ;;  %v520_v63 = vor.u32 %v519_v51, %v516_v50  ;;  %v533_v61 = vshll.u32 %v287_v26, 16  ;;  %v5319_v2 = vrot.slane %v5303_v48, 9 }
  0x62   : > { %v525_v58 = vrot.slane %v523_v52, 5  ;;  %v512_v6 = vsel %vm6550_vm4, %v507_v62, %v511_v38  ;;  %5903 = vmatprep.mubr.msk.bf16.mxu0 %vm730_vm3, %v5334_v55  ;;  %v2855_v5 = vsel %vm6776_vm7, %v6593_v30, %v2854_v28  ;;  %v538_v17 = vshrl.u32 %v6802_v53, 16  ;;  %v289_v52 = vld [vmem:[%s6524_s27 + $0x8c] sm:$0x1] }
  0x63   : > { %v529_v7 = vrot.slane %v527_v56, 4  ;;  %v5054_v11 = vcombine.low %v502_v15, %v512_v6  ;;  %v521_v14 = vrot.slane %v520_v63, 4  ;;  %v535_v18 = vrot.slane %v533_v61, 5 }
  0x64   : > { %v2852_v21 = vsel %vm6776_vm7, %v5319_v2, %v2851_v22  ;;  %v540_v38 = vrot.slane %v538_v17, 4  ;;  %v541_v1 = vshll.u32 %v6802_v53, 16  ;;  %v547_v30 = vshll.u32 %v6809_v16, 16  ;;  %v6841_v22 = vld [vmem:[%s8297_s1 + $0x1c] sm:$0xf] }
  0x65   : > { %v530_v25 = vor.u32 %v529_v7, %v525_v58  ;;  %v5335_v31 = vcombine.low %v2852_v21, %v2855_v5  ;;  %5749 = vmatprep.mubr.msk.bf16.mxu1 %vm730_vm3, %v5054_v11  ;;  %v526_v28 = vsel %vm6550_vm4, %v521_v14, %v525_v58  ;;  %v551_v60 = vshrl.u32 %v6809_v16, 16  ;;  %v6860_v5 = vld [vmem:[%s6524_s27 + $0x90] sm:$0xf] }
  0x66   : > { %v557_v42 = vshll.u32 %v288_v57, 16  ;;  %v543_v45 = vrot.slane %v541_v1, 5  ;;  %v5320_v47 = vrot.slane %v5304_v10, 9  ;;  %v2858_v26 = vrot.slane %v6600_v46, 5  ;;  %v5305_v57 = vld [vmem:[%s6524_s27 + $0x30] sm:$0xe] }
  0x67   : > { %v531_v44 = vrot.slane %v530_v25, 4  ;;  %v549_v48 = vrot.slane %v547_v30, 5  ;;  %v553_v49 = vrot.slane %v551_v60, 4  ;;  %v2861_v51 = vrot.slane %v6609_v54, 5  ;;  %v6872_v30 = vld [vmem:[%s6524_s27 + $0x94] sm:$0xf] }
  0x68   : > { %v559_v50 = vrot.slane %v557_v42, 5  ;;  %5904 = vmatmul.mubr.msk.bf16.vlgmr.msra.gmra.mrb[0].mxu0 %vm730_vm3, %v5335_v31  ;;  %v544_v62 = vor.u32 %v543_v45, %v540_v38  ;;  %v2859_v55 = vsel %vm6776_vm7, %v5320_v47, %v2858_v26  ;;  %v2860_v56 = vrot.slane %v2858_v26, 4  ;;  %v290_v60 = vld [vmem:[%s6524_s27 + $0x98] sm:$0x1]  ;;  %v5306_v26 = vld [vmem:[%s6524_s27 + $0x3c] sm:$0xe] }
  0x69   : > { %v536_v15 = vsel %vm6550_vm4, %v531_v44, %v535_v18  ;;  %5936 = vmatpush3.bf16.msra.mxu0 %v6560_v41  ;;  %v554_v46 = vor.u32 %v553_v49, %v549_v48  ;;  %v562_v58 = vshrl.u32 %v6828_v39, 16  ;;  %v565_v54 = vshll.u32 %v6828_v39, 16 }
  0x6a   : > { %v5055_v63 = vcombine.low %v526_v28, %v536_v15  ;;  %v545_v61 = vrot.slane %v544_v62, 4  ;;  %v2862_v2 = vsel %vm6776_vm7, %v2860_v56, %v2861_v51  ;;  %v571_v6 = vshll.u32 %v6836_v43, 16  ;;  %6303 = vmatprep.subr.msk.bf16.mxu0 %vm779_vm0, %v6841_v22 }
  0x6b   : > { %v575_v7 = vshrl.u32 %v6836_v43, 16  ;;  %v555_v41 = vrot.slane %v554_v46, 4  ;;  %v5336_v17 = vcombine.low %v2859_v55, %v2862_v2  ;;  %v564_v10 = vrot.slane %v562_v58, 4  ;;  %v6892_v46 = vld [vmem:[%s6524_s27 + $0xa0] sm:$0xf] }
  0x6c   : > { %5750 = vmatmul.mubr.msk.bf16.gmra.mrb[16].mxu1 %vm730_vm3, %v5055_v63  ;;  %v567_v11 = vrot.slane %v565_v54, 5  ;;  %v550_v14 = vsel %vm6550_vm4, %v545_v61, %v549_v48  ;;  %v573_v18 = vrot.slane %v571_v6, 5  ;;  %v581_v25 = vshll.u32 %v289_v52, 16  ;;  %v6881_v52 = vld [vmem:[%s6524_s27 + $0x9c] sm:$0xf] }
  0x6d   : > { %v577_v21 = vrot.slane %v575_v7, 4  ;;  %v560_v31 = vsel %vm6550_vm4, %v555_v41, %v559_v50  ;;  %5907 = vmatprep.mubr.msk.bf16.mxu0 %vm730_vm3, %v5336_v17  ;;  %v5321_v1 = vrot.slane %v5305_v57, 9  ;;  %v2865_v28 = vrot.slane %v6629_v33, 5 }
  0x6e   : > { %v568_v38 = vor.u32 %v567_v11, %v564_v10  ;;  %v5056_v42 = vcombine.low %v550_v14, %v560_v31  ;;  %v583_v45 = vrot.slane %v581_v25, 5  ;;  %v2868_v47 = vrot.slane %v6637_v40, 5  ;;  %v291_v10 = vld [vmem:[%s6524_s27 + $0xa4] sm:$0x1]  ;;  %v5307_v11 = vld [vmem:[%s6524_s27 + $0x48] sm:$0xe] }
  0x6f   : > { %v578_v44 = vor.u32 %v577_v21, %v573_v18  ;;  %v2866_v49 = vsel %vm6776_vm7, %v5321_v1, %v2865_v28  ;;  %v2867_v50 = vrot.slane %v2865_v28, 4  ;;  %v586_v51 = vshrl.u32 %v6860_v5, 16 }
  0x70   : > { %v569_v48 = vrot.slane %v568_v38, 4  ;;  %5753 = vmatprep.mubr.msk.bf16.mxu1 %vm730_vm3, %v5056_v42  ;;  %v589_v15 = vshll.u32 %v6860_v5, 16  ;;  %v595_v62 = vshll.u32 %v6872_v30, 16  ;;  %v599_v40 = vshrl.u32 %v6872_v30, 16 }
  0x71   : > { %v579_v33 = vrot.slane %v578_v44, 4  ;;  %v2869_v56 = vsel %vm6776_vm7, %v2867_v50, %v2868_v47  ;;  %v588_v57 = vrot.slane %v586_v51, 4  ;;  %v605_v63 = vshll.u32 %v290_v60, 16 }
  0x72   : > { %v574_v55 = vsel %vm6550_vm4, %v569_v48, %v573_v18  ;;  %v5337_v54 = vcombine.low %v2866_v49, %v2869_v56  ;;  %v591_v61 = vrot.slane %v589_v15, 5  ;;  %v597_v2 = vrot.slane %v595_v62, 5  ;;  %v6918_v56 = vld [vmem:[%s6524_s27 + $0xac] sm:$0xf] }
  0x73   : > { %v584_v58 = vsel %vm6550_vm4, %v579_v33, %v583_v45  ;;  %v601_v7 = vrot.slane %v599_v40, 4  ;;  %v607_v41 = vrot.slane %v605_v63, 5  ;;  %v5322_v17 = vrot.slane %v5306_v26, 9  ;;  %v6913_v33 = vld [vmem:[%s6524_s27 + $0xa8] sm:$0xf] }
  0x74   : > { %v5057_v6 = vcombine.low %v574_v55, %v584_v58  ;;  %5908 = vmatmul.mubr.msk.bf16.gmra.mrb[4].mxu0 %vm730_vm3, %v5337_v54  ;;  %v592_v14 = vor.u32 %v591_v61, %v588_v57  ;;  %v2872_v18 = vrot.slane %v6654_v20, 5  ;;  %v2875_v21 = vrot.slane %v6659_v34, 5  ;;  %v292_v61 = vld [vmem:[%s6524_s27 + $0xb0] sm:$0x1] }
  0x75   : > { %v610_v25 = vshrl.u32 %v6881_v52, 16  ;;  %v602_v31 = vor.u32 %v601_v7, %v597_v2  ;;  %v613_v38 = vshll.u32 %v6881_v52, 16  ;;  %v619_v1 = vshll.u32 %v6892_v46, 16 }
  0x76   : > { %5754 = vmatmul.mubr.msk.bf16.gmra.mrb[20].mxu1 %vm730_vm3, %v5057_v6  ;;  %v623_v28 = vshrl.u32 %v6892_v46, 16  ;;  %v593_v60 = vrot.slane %v592_v14, 4  ;;  %v2873_v42 = vsel %vm6776_vm7, %v5322_v17, %v2872_v18  ;;  %v2874_v20 = vrot.slane %v2872_v18, 4  ;;  %v6933_v14 = vld [vmem:[%s6524_s27 + $0xb4] sm:$0xf] }
  0x77   : > { %v612_v44 = vrot.slane %v610_v25, 4  ;;  %v603_v34 = vrot.slane %v602_v31, 4  ;;  %v615_v45 = vrot.slane %v613_v38, 5  ;;  %v621_v47 = vrot.slane %v619_v1, 5 }
  0x78   : > { %v625_v26 = vrot.slane %v623_v28, 4  ;;  %v598_v48 = vsel %vm6550_vm4, %v593_v60, %v597_v2  ;;  %v2876_v49 = vsel %vm6776_vm7, %v2874_v20, %v2875_v21  ;;  %v629_v50 = vshll.u32 %v291_v10, 16  ;;  %v5308_v2 = vld [vmem:[%s6524_s27 + $0x54] sm:$0xe] }
  0x79   : > { %v5323_v51 = vrot.slane %v5307_v11, 9  ;;  %v608_v15 = vsel %vm6550_vm4, %v603_v34, %v607_v41  ;;  %v5338_v62 = vcombine.low %v2873_v42, %v2876_v49  ;;  %v616_v40 = vor.u32 %v615_v45, %v612_v44  ;;  %v6942_v42 = vld [vmem:[%s6524_s27 + $0xb8] sm:$0xf]  ;;  %v293_v49 = vld [vmem:[%s6524_s27 + $0xbc] sm:$0x1] }
  0x7a   : > { %v626_v55 = vor.u32 %v625_v26, %v621_v47  ;;  %v5058_v57 = vcombine.low %v598_v48, %v608_v15  ;;  %v631_v63 = vrot.slane %v629_v50, 5  ;;  %v2879_v58 = vrot.slane %v6677_v8, 5 }
  0x7b   : > { %v2882_v54 = vrot.slane %v6685_v23, 5  ;;  %5911 = vmatprep.mubr.msk.bf16.mxu0 %vm730_vm3, %v5338_v62  ;;  %v617_v6 = vrot.slane %v616_v40, 4  ;;  %v634_v41 = vshrl.u32 %v6913_v33, 16  ;;  %v637_v17 = vshll.u32 %v6913_v33, 16 }
  0x7c   : > { %v627_v7 = vrot.slane %v626_v55, 4  ;;  %5757 = vmatprep.mubr.msk.bf16.mxu1 %vm730_vm3, %v5058_v57  ;;  %v2880_v10 = vsel %vm6776_vm7, %v5323_v51, %v2879_v58  ;;  %v2881_v11 = vrot.slane %v2879_v58, 4  ;;  %v643_v8 = vshll.u32 %v6918_v56, 16  ;;  %v5309_v55 = vld [vmem:[%s6524_s27 + $0x60] sm:$0xe] }
  0x7d   : > { %v647_v23 = vshrl.u32 %v6918_v56, 16  ;;  %v622_v18 = vsel %vm6550_vm4, %v617_v6, %v621_v47  ;;  %v636_v25 = vrot.slane %v634_v41, 4  ;;  %v639_v31 = vrot.slane %v637_v17, 5  ;;  %v5310_v6 = vld [vmem:[%s6524_s27 + $0x6c] sm:$0xe] }
  0x7e   : > { %v632_v21 = vsel %vm6550_vm4, %v627_v7, %v631_v63  ;;  %v2883_v1 = vsel %vm6776_vm7, %v2881_v11, %v2882_v54  ;;  %v645_v28 = vrot.slane %v643_v8, 5  ;;  %v653_v34 = vshll.u32 %v292_v61, 16  ;;  %v5247_v11 = vld [vmem:[%s6524_s27 + $0x70] sm:$0xf]  ;;  %v5248_v8 = vld [vmem:[%s6524_s27 + $0x74] sm:$0x1] }
  0x7f   : > { %v5059_v38 = vcombine.low %v622_v18, %v632_v21  ;;  %v649_v60 = vrot.slane %v647_v23, 4  ;;  %v5339_v20 = vcombine.low %v2880_v10, %v2883_v1  ;;  %v640_v44 = vor.u32 %v639_v31, %v636_v25 }
  0x80   : > { %v5324_v45 = vrot.slane %v5308_v2, 9  ;;  %v2886_v26 = vrot.slane %v6708_v4, 5  ;;  %v2889_v48 = vrot.slane %v6714_v12, 5  ;;  %v658_v50 = vshrl.u32 %v6933_v14, 16 }
  0x81   : > { %5758 = vmatmul.mubr.msk.bf16.gmra.mrb[24].mxu1 %vm730_vm3, %v5059_v38  ;;  %v650_v47 = vor.u32 %v649_v60, %v645_v28  ;;  %5912 = vmatmul.mubr.msk.bf16.gmra.mrb[8].mxu0 %vm730_vm3, %v5339_v20  ;;  %v641_v51 = vrot.slane %v640_v44, 4  ;;  %v655_v15 = vrot.slane %v653_v34, 5  ;;  %v661_v62 = vshll.u32 %v6933_v14, 16 }
  0x82   : > { %v667_v40 = vshll.u32 %v6942_v42, 16  ;;  %v2887_v4 = vsel %vm6776_vm7, %v5324_v45, %v2886_v26  ;;  %v2888_v12 = vrot.slane %v2886_v26, 4  ;;  %v660_v63 = vrot.slane %v658_v50, 4 }
  0x83   : > { %v651_v57 = vrot.slane %v650_v47, 4  ;;  %v646_v58 = vsel %vm6550_vm4, %v641_v51, %v645_v28  ;;  %v663_v54 = vrot.slane %v661_v62, 5  ;;  %v671_v2 = vshrl.u32 %v6942_v42, 16  ;;  %v5311_v47 = vld [vmem:[%s6524_s27 + $0x78] sm:$0xe] }
  0x84   : > { %v669_v61 = vrot.slane %v667_v40, 5  ;;  %v2890_v41 = vsel %vm6776_vm7, %v2888_v12, %v2889_v48  ;;  %v677_v17 = vshll.u32 %v293_v49, 16  ;;  %v5325_v10 = vrot.slane %v5309_v55, 9  ;;  %v6378_v51 = vld [vmem:[%s6524_s27] sm:$0xf] }
  0x85   : > { %v656_v7 = vsel %vm6550_vm4, %v651_v57, %v655_v15  ;;  %v5340_v18 = vcombine.low %v2887_v4, %v2890_v41  ;;  %v664_v21 = vor.u32 %v663_v54, %v660_v63  ;;  %v673_v25 = vrot.slane %v671_v2, 4  ;;  %v6980_v15 = vld [vmem:[%s6524_s27 + $0x4] sm:$0xf]  ;;  %v6984_v40 = vld [vmem:[%s6524_s27 + $0x7c] sm:$0xf] }
  0x86   : > { %v5060_v23 = vcombine.low %v646_v58, %v656_v7  ;;  %v679_v31 = vrot.slane %v677_v17, 5  ;;  %v2893_v38 = vrot.slane %v6738_v59, 5  ;;  %v2896_v1 = vrot.slane %v6745_v9, 5  ;;  %v6987_v55 = vld [vmem:[%s6524_s27 + $0x80] sm:$0x1] }
  0x87   : > { %v5326_v28 = vrot.slane %v5310_v6, 9  ;;  %5915 = vmatprep.mubr.msk.bf16.mxu0 %vm730_vm3, %v5340_v18  ;;  %v665_v60 = vrot.slane %v664_v21, 4  ;;  %v674_v20 = vor.u32 %v673_v25, %v669_v61  ;;  %v2900_v44 = vrot.slane %v5247_v11, 5  ;;  %v5253_v57 = vld [vmem:[%s6524_s27 + $0x88] sm:$0xf] }
  0x88   : > { %5761 = vmatprep.mubr.msk.bf16.mxu1 %vm730_vm3, %v5060_v23  ;;  %v2903_v34 = vrot.slane %v5248_v8, 5  ;;  %v2894_v45 = vsel %vm6776_vm7, %v5325_v10, %v2893_v38  ;;  %v2895_v59 = vrot.slane %v2893_v38, 4  ;;  %v5078_v62 = vcombine.low %v6378_v51, %v6980_v15  ;;  %v5254_v54 = vld [vmem:[%s6524_s27 + $0x8c] sm:$0x1]  ;;  %v5256_v17 = vld [vmem:[%s6524_s27 + $0x94] sm:$0xf] }
  0x89   : > { %v670_v9 = vsel %vm6550_vm4, %v665_v60, %v669_v61  ;;  %v675_v26 = vrot.slane %v674_v20, 4  ;;  %v2901_v48 = vsel %vm6776_vm7, %v5326_v28, %v2900_v44  ;;  %v2902_v49 = vrot.slane %v2900_v44, 4  ;;  %v5312_v61 = vld [vmem:[%s6524_s27 + $0x84] sm:$0xe]  ;;  %v5313_v23 = vld [vmem:[%s6524_s27 + $0x90] sm:$0xe] }
  0x8a   : > { %v2897_v50 = vsel %vm6776_vm7, %v2895_v59, %v2896_v1  ;;  %v5327_v58 = vrot.slane %v5311_v47, 9  ;;  %v2907_v7 = vrot.slane %v6984_v40, 5  ;;  %v2910_v41 = vrot.slane %v6987_v55, 5  ;;  %v5257_v25 = vld [vmem:[%s6524_s27 + $0x98] sm:$0x1] }
  0x8b   : > { %v680_v4 = vsel %vm6550_vm4, %v675_v26, %v679_v31  ;;  %v5341_v12 = vcombine.low %v2894_v45, %v2897_v50  ;;  %v2904_v63 = vsel %vm6776_vm7, %v2902_v49, %v2903_v34  ;;  %v5328_v10 = vrot.slane %v5312_v61, 9  ;;  %v5259_v31 = vld [vmem:[%s6524_s27 + $0xa0] sm:$0xf]  ;;  %v5260_v60 = vld [vmem:[%s6524_s27 + $0xa4] sm:$0x1] }
  0x8c   : > { %v5061_v2 = vcombine.low %v670_v9, %v680_v4  ;;  %v5342_v6 = vcombine.low %v2901_v48, %v2904_v63  ;;  %v2914_v11 = vrot.slane %v5253_v57, 5  ;;  %v2917_v8 = vrot.slane %v5254_v54, 5  ;;  %v5314_v20 = vld [vmem:[%s6524_s27 + $0x9c] sm:$0xe]  ;;  %v6380_v44 = vld [vmem:[%s6524_s27 + $0xc] sm:$0xf] }
  0x8d   : > { %5916 = vmatmul.mubr.msk.bf16.gmra.mrb[12].mxu0 %vm730_vm3, %v5341_v12  ;;  %v2908_v18 = vsel %vm6776_vm7, %v5327_v58, %v2907_v7  ;;  %v2909_v21 = vrot.slane %v2907_v7, 4  ;;  %v2921_v28 = vrot.slane %v5256_v17, 5  ;;  %v7014_v34 = vld [vmem:[%s6524_s27 + $0x10] sm:$0xf]  ;;  %v6382_v47 = vld [vmem:[%s6524_s27 + $0x18] sm:$0xf] }
  0x8e   : > { %5762 = vmatmul.mubr.msk.bf16.gmra.mrb[28].mxu1 %vm730_vm3, %v5061_v2  ;;  %5919 = vmatprep.mubr.msk.bf16.mxu0 %vm730_vm3, %v5342_v6  ;;  %v2915_v38 = vsel %vm6776_vm7, %v5328_v10, %v2914_v11  ;;  %v2916_v1 = vrot.slane %v2914_v11, 4  ;;  %v5079_v45 = vcombine.low %v6380_v44, %v7014_v34  ;;  %v7021_v9 = vld [vmem:[%s6524_s27 + $0x1c] sm:$0xf]  ;;  %v5329_v48 = vrot.slane %v5313_v23, 9  ;;  %v5262_v57 = vld [vmem:[%s6524_s27 + $0xac] sm:$0xf] }
  0x8f   : > { %5767 = vmatprep.mubr.msk.bf16.mxu1 %vm730_vm3, %v5078_v62  ;;  %v2911_v59 = vsel %vm6776_vm7, %v2909_v21, %v2910_v41  ;;  %v5080_v26 = vcombine.low %v6382_v47, %v7021_v9  ;;  %v2923_v51 = vrot.slane %v2921_v28, 4  ;;  %v2924_v62 = vrot.slane %v5257_v25, 5  ;;  %v6384_v54 = vld [vmem:[%s8297_s1 + $0x8] sm:$0xf]  ;;  %v5265_v2 = vld [vmem:[%s6524_s27 + $0xb8] sm:$0xf] }
  0x90   : > { %v5343_v49 = vcombine.low %v2908_v18, %v2911_v59  ;;  %v2918_v50 = vsel %vm6776_vm7, %v2916_v1, %v2917_v8  ;;  %v5330_v12 = vrot.slane %v5314_v20, 9  ;;  %v2928_v63 = vrot.slane %v5259_v31, 5  ;;  %v7036_v7 = vld [vmem:[%s8297_s1 + $0xc] sm:$0xf]  ;;  %v5263_v10 = vld [vmem:[%s6524_s27 + $0xb0] sm:$0x1] }
  0x91   : > { %v5344_v4 = vcombine.low %v2915_v38, %v2918_v50  ;;  %v2931_v58 = vrot.slane %v5260_v60, 5  ;;  %v1497_v61 = vsel %vm779_vm0, %v6384_v54, 0  ;;  %v2922_v41 = vsel %vm6776_vm7, %v5329_v48, %v2921_v28  ;;  %v5315_v11 = vld [vmem:[%s6524_s27 + $0xa8] sm:$0xe]  ;;  %v5266_v25 = vld [vmem:[%s6524_s27 + $0xbc] sm:$0x1] }
  0x92   : > { %v2930_v6 = vrot.slane %v2928_v63, 4  ;;  %v2925_v17 = vsel %vm6776_vm7, %v2923_v51, %v2924_v62  ;;  %v2935_v8 = vrot.slane %v5262_v57, 5  ;;  %v2929_v23 = vsel %vm6776_vm7, %v5330_v12, %v2928_v63  ;;  %v5316_v31 = vld [vmem:[%s6524_s27 + $0xb4] sm:$0xe]  ;;  %v6385_v38 = vld [vmem:[%s6524_s27 + $0x24] sm:$0xf] }
  0x93   : > { %v2942_v21 = vrot.slane %v5265_v2, 5  ;;  %v7057_v1 = vld [vmem:[%s6524_s27 + $0x28] sm:$0xf]  ;;  %v5345_v60 = vcombine.low %v2922_v41, %v2925_v17  ;;  %v5331_v44 = vrot.slane %v5315_v11, 9  ;;  %v2938_v59 = vrot.slane %v5263_v10, 5 }
  0x94   : > { %v2932_v18 = vsel %vm6776_vm7, %v2930_v6, %v2931_v58  ;;  %v5081_v28 = vcombine.low %v6385_v38, %v7057_v1  ;;  %v6387_v47 = vld [vmem:[%s6524_s27 + $0x30] sm:$0xf]  ;;  %v2945_v51 = vrot.slane %v5266_v25, 5  ;;  %v5268_v62 = vld [vmem:[%s6524_s27 + $0xc4] sm:$0xf]  ;;  %v2331_v25 = vshrl.u32 %v6984_v40, 16 }
  0x95   : > { %5920 = vmatmul.mubr.msk.bf16.gmra.mrb[16].mxu0 %vm730_vm3, %v5343_v49  ;;  %v5346_v20 = vcombine.low %v2929_v23, %v2932_v18  ;;  %v5332_v49 = vrot.slane %v5316_v31, 9  ;;  %v2944_v50 = vrot.slane %v2942_v21, 4  ;;  %v2936_v57 = vsel %vm6776_vm7, %v5331_v44, %v2935_v8  ;;  %v5317_v12 = vld [vmem:[%s6524_s27 + $0xc0] sm:$0xe]  ;;  %v6389_v41 = vld [vmem:[%s6524_s27 + $0x3c] sm:$0xf] }
  0x96   : > { %5768 = vmatmul.mubr.msk.bf16.vlgmr.msra.gmra.mrb[0].mxu1 %vm730_vm3, %v5079_v45  ;;  %5923 = vmatprep.mubr.msk.bf16.mxu0 %vm730_vm3, %v5344_v4  ;;  %v2937_v45 = vrot.slane %v2935_v8, 4  ;;  %v2949_v63 = vrot.slane %v5268_v62, 5  ;;  %v5333_v6 = vrot.slane %v5317_v12, 9  ;;  %v7082_v17 = vld [vmem:[%s6524_s27 + $0x40] sm:$0xf]  ;;  %v5084_v18 = vcombine.low %v6689_v27, %v6692_v36  ;;  %v6341_v62 = vld [vmem:[%s6524_s27 + $0x24] sm:$0xff]  }
  0x97   : > { %5800 = vmatpush3.bf16.msra.mxu1 %v1497_v61  ;;  %5771 = vmatprep.mubr.msk.bf16.mxu1 %vm730_vm3, %v5080_v26  ;;  %v7062_v26 = vld [vmem:[%s6524_s27 + $0x34] sm:$0xf]  ;;  %v2943_v58 = vsel %vm6776_vm7, %v5332_v49, %v2942_v21  ;;  %v2946_v54 = vsel %vm6776_vm7, %v2944_v50, %v2945_v51  ;;  %v5269_v61 = vld [vmem:[%s6524_s27 + $0xc8] sm:$0x1]  ;;  %v5083_v10 = vcombine.low %v6389_v41, %v7082_v17  ;;  %v2327_v21 = vshll.u32 %v6984_v40, 16 }
  0x98   : > { %6298 = vmatprep.subr.msk.bf16.mxu1 %vm779_vm0, %v7036_v7  ;;  %v5082_v48 = vcombine.low %v6387_v47, %v7062_v26  ;;  %v2939_v4 = vsel %vm6776_vm7, %v2937_v45, %v2938_v59  ;;  %v5348_v11 = vcombine.low %v2943_v58, %v2946_v54  ;;  %v2951_v8 = vrot.slane %v2949_v63, 4  ;;  %v1236_v45 = vld [vmem:[%s6524_s27] sm:$0xe]  ;;  %v1237_v59 = vld [vmem:[%s6524_s27 + $0xc] sm:$0xe] }
  0x99   : > { %v5347_v2 = vcombine.low %v2936_v57, %v2939_v4  ;;  %v2952_v23 = vrot.slane %v5269_v61, 5  ;;  %v2950_v31 = vsel %vm6776_vm7, %v5333_v6, %v2949_v63  ;;  %v7097_v27 = vrot.slane %v2327_v21, 5  ;;  %v1240_v41 = vld [vmem:[%s6524_s27 + $0x30] sm:$0xe] }
  0x9a   : > { %v2333_v36 = vrot.slane %v2331_v25, 4  ;;  %v5086_v44 = vcombine.low %v6749_v19, %v6755_v35  ;;  %v2337_v47 = vshll.u32 %v6987_v55, 16  ;;  %v5110_v19 = vrot.slane %v1236_v45, 9 }
  0x9b   : > { %v2953_v38 = vsel %vm6776_vm7, %v2951_v8, %v2952_v23  ;;  %8318 = vst [vmem:[#allocation3_spill] sm:$0xff] %v7097_v27  ;;  %v5111_v35 = vrot.slane %v1237_v59, 9  ;;  %v1303_v4 = vrot.slane %v7021_v9, 5  ;;  %v1310_v12 = vrot.slane %v7057_v1, 5  ;;  %v1241_v8 = vld [vmem:[%s6524_s27 + $0x3c] sm:$0xe] }
  0x9c   : > { %v5349_v40 = vcombine.low %v2950_v31, %v2953_v38  ;;  %v2334_v49 = vor.u32 %v2333_v36, %v7097_v27  ;;  %v7117_v51 = vrot.slane %v2337_v47, 5  ;;  %v5087_v58 = vcombine.low %v6770_v0, %v6783_v29  ;;  %v1242_v31 = vld [vmem:[%s6524_s27 + $0x48] sm:$0xe]  ;;  %v6395_v59 = vld [vmem:[%s6524_s27 + $0x38] sm:$0x1] }
  0x9d   : > { %5924 = vmatmul.mubr.msk.bf16.gmra.mrb[20].mxu0 %vm730_vm3, %v5345_v60  ;;  %v5085_v60 = vcombine.low %v6718_v24, %v6724_v37  ;;  %v6392_v24 = vld [vmem:[%s6524_s27 + $0x14] sm:$0x1]  ;;  %v4138_v54 = vsel %vm779_vm0, %v6841_v22, 0  ;;  %v5088_v61 = vcombine.low %v6802_v53, %v6809_v16  ;;  %v5089_v6 = vcombine.low %v6828_v39, %v6836_v43  ;;  %v6393_v16 = vld [vmem:[%s6524_s27 + $0x20] sm:$0x1] }
  0x9e   : > { %5772 = vmatmul.mubr.msk.bf16.gmra.mrb[4].mxu1 %vm730_vm3, %v5081_v28  ;;  %5927 = vmatprep.mubr.msk.bf16.mxu0 %vm730_vm3, %v5346_v20  ;;  %v1296_v28 = vrot.slane %v7014_v34, 5  ;;  %v6339_v20 = vld [vmem:[%s6524_s27 + $0x18] sm:$0xff]   ;;  %v6391_v34 = vld [vmem:[%s6524_s27 + $0x8] sm:$0x1]  ;;  %v1299_v37 = vrot.slane %v6392_v24, 5  ;;  %8319 = vst [vmem:[#allocation4_spill] sm:$0xff] %v7117_v51  ;;  %v5090_v9 = vcombine.low %v6860_v5, %v6872_v30 }
  0x9f   : > { %5775 = vmatprep.mubr.msk.bf16.mxu1 %vm730_vm3, %v5082_v48  ;;  %v1289_v48 = vrot.slane %v6980_v15, 5  ;;  %v1292_v50 = vrot.slane %v6391_v34, 5  ;;  %v1238_v15 = vld [vmem:[%s6524_s27 + $0x18] sm:$0xe]  ;;  %v7122_v63 = vrot.slane %v2334_v49, 4  ;;  %v1306_v22 = vrot.slane %v6393_v16, 5 }
  0xa0   : > { %v1298_v55 = vrot.slane %v1296_v28, 4  ;;  %v5112_v1 = vrot.slane %v1238_v15, 9  ;;  %v7144_v29 = vsel %vm6776_vm7, %v5111_v35, %v1296_v28  ;;  %v1312_v25 = vrot.slane %v1310_v12, 4  ;;  %v5430_v24 = vld [vmem:[%s6524_s27 + $0x18] sm:$0xf] }
  0xa1   : > { %v1291_v57 = vrot.slane %v1289_v48, 4  ;;  %8320 = vst [vmem:[#allocation5_spill] sm:$0xff] %v7122_v63  ;;  %v7140_v0 = vsel %vm6776_vm7, %v5110_v19, %v1289_v48  ;;  %v1320_v47 = vrot.slane %v6395_v59, 5  ;;  %v7181_v49 = vsel %vm779_vm0, %v7036_v7, 0  ;;  %v5431_v7 = vld [vmem:[%s6524_s27 + $0x1c] sm:$0xf] }
  0xa2   : > { %v7148_v53 = vsel %vm6776_vm7, %v1298_v55, %v1299_v37  ;;  %v7185_v34 = vsel %vm6776_vm7, %v5112_v1, %v1303_v4  ;;  %v6345_v37 = vld [vmem:[%s6524_s27 + $0x3c] sm:$0xff]   ;;  %v5115_v35 = vrot.slane %v1241_v8, 9  ;;  %v6396_v55 = vld [vmem:[%s6524_s27 + $0x44] sm:$0x1]  ;;  %v3660_v8 = vshll.u32 %v5430_v24, 16 }
  0xa3   : > { %v7159_v23 = vsel %vm6776_vm7, %v1291_v57, %v1292_v50  ;;  %v1243_v50 = vld [vmem:[%s6524_s27 + $0x54] sm:$0xe]  ;;  %v1327_v15 = vrot.slane %v6396_v55, 5  ;;  %v5434_v39 = vld [vmem:[%s6524_s27 + $0x28] sm:$0xf] }
  0xa4   : > { %v6403_v5 = vld [vmem:[%s6524_s27 + $0x70] sm:$0xf] }
  0xa5   : > { %5928 = vmatmul.mubr.msk.bf16.gmra.mrb[24].mxu0 %vm730_vm3, %v5347_v2  ;;  %v1239_v2 = vld [vmem:[%s6524_s27 + $0x24] sm:$0xe]  ;;  %v1352_v30 = vrot.slane %v6403_v5, 5 }
  0xa6   : > { %5776 = vmatmul.mubr.msk.bf16.gmra.mrb[8].mxu1 %vm730_vm3, %v5083_v10  ;;  %5931 = vmatprep.mubr.msk.bf16.mxu0 %vm730_vm3, %v5348_v11  ;;  %v1317_v10 = vrot.slane %v7062_v26, 5  ;;  %v6343_v11 = vld [vmem:[%s6524_s27 + $0x30] sm:$0xff]   ;;  %v7155_v26 = vld [vmem:[%s8297_s1 + $0x20] sm:$0xf]  ;;  %v5113_v21 = vrot.slane %v1239_v2, 9 }
  0xa7   : > { %5779 = vmatprep.mubr.msk.bf16.mxu1 %vm730_vm3, %v5084_v18  ;;  %v1305_v18 = vrot.slane %v1303_v4, 4  ;;  %v1354_v48 = vrot.slane %v1352_v30, 4 }
  0xa8   : > { %v1319_v45 = vrot.slane %v1317_v10, 4  ;;  %v7192_v19 = vsel %vm6776_vm7, %v5113_v21, %v1310_v12  ;;  %v3670_v21 = vshrl.u32 %v5431_v7, 16 }
  0xa9   : > { %v7201_v4 = vsel %vm6776_vm7, %v1305_v18, %v1306_v22  ;;  %v3657_v22 = vshrl.u32 %v5430_v24, 16  ;;  %v3666_v18 = vshll.u32 %v5431_v7, 16  ;;  %v5433_v24 = vld [vmem:[%s6524_s27 + $0x24] sm:$0xf] }
  0xaa   : > { %v7214_v1 = vsel %vm6776_vm7, %v1319_v45, %v1320_v47 }
  0xab   : > { %v3659_v43 = vrot.slane %v3657_v22, 4  ;;  %v7256_v7 = vrot.slane %v3666_v18, 5  ;;  %v3684_v22 = vshll.u32 %v5433_v24, 16  ;;  %v3694_v18 = vshrl.u32 %v5434_v39, 16 }
  0xad   : > { %5932 = vmatmul.mubr.msk.bf16.gmra.mrb[28].mxu0 %vm730_vm3, %v5349_v40  ;;  %v6394_v40 = vld [vmem:[%s6524_s27 + $0x2c] sm:$0x1]  ;;  %v3686_v27 = vrot.slane %v3684_v22, 5 }
  0xae   : > { %5780 = vmatmul.mubr.msk.bf16.gmra.mrb[12].mxu1 %vm730_vm3, %v5085_v60  ;;  %5937 = vmatprep.mubr.msk.bf16.mxu0 %vm730_vm3, %v6339_v20  ;;  %v1313_v28 = vrot.slane %v6394_v40, 5  ;;  %v1324_v60 = vrot.slane %v7082_v17, 5  ;;  %v6399_v40 = vld [vmem:[%s6524_s27 + $0x50] sm:$0x1]  ;;  %v6404_v17 = vld [vmem:[%s6524_s27 + $0x74] sm:$0x1] }
  0xaf   : > { %5783 = vmatprep.mubr.msk.bf16.mxu1 %vm730_vm3, %v5086_v44  ;;  %v5114_v44 = vrot.slane %v1240_v41, 9  ;;  %v5117_v41 = vrot.slane %v1243_v50, 9  ;;  %v1244_v50 = vld [vmem:[%s6524_s27 + $0x60] sm:$0xe]  ;;  %v5435_v20 = vld [vmem:[%s6524_s27 + $0x2c] sm:$0x1] }
  0xb0   : > { %v1326_v12 = vrot.slane %v1324_v60, 4  ;;  %v7227_v45 = vsel %vm6776_vm7, %v5115_v35, %v1324_v60  ;;  %v6400_v35 = vld [vmem:[%s6524_s27 + $0x5c] sm:$0x1] }
  0xb1   : > { %v7210_v2 = vsel %vm6776_vm7, %v5114_v44, %v1317_v10  ;;  %v1341_v55 = vrot.slane %v6400_v35, 5  ;;  %v1245_v35 = vld [vmem:[%s6524_s27 + $0x6c] sm:$0xe] }
  0xb2   : > { %v7231_v59 = vsel %vm6776_vm7, %v1326_v12, %v1327_v15  ;;  %v6401_v15 = vld [vmem:[%s6524_s27 + $0x64] sm:$0xf]  ;;  %v3672_v12 = vrot.slane %v3670_v21, 4  ;;  %v5119_v5 = vrot.slane %v1245_v35, 9 }
  0xb3   : > { %v6351_v21 = vld [vmem:[%s6524_s27 + $0x60] sm:$0xff]  }
  0xb5   : > { %5938 = vmatmul.mubr.msk.bf16.vlgmr.msra.gmra.mrb[0].mxu0 %vm730_vm3, %v6341_v62  ;;  %v6397_v62 = vld [vmem:[%s6524_s27 + $0x4c] sm:$0xf] }
  0xb6   : > { %5784 = vmatmul.mubr.msk.bf16.gmra.mrb[16].mxu1 %vm730_vm3, %v5087_v58  ;;  %5970 = vmatpush3.bf16.msra.mxu0 %v4138_v54  ;;  %v1331_v57 = vrot.slane %v6397_v62, 5  ;;  %v7205_v58 = vsel %vm6776_vm7, %v1312_v25, %v1313_v28  ;;  %v5116_v54 = vrot.slane %v1242_v31, 9  ;;  %v1334_v28 = vrot.slane %v6399_v40, 5 }
  0xb7   : > { %5787 = vmatprep.mubr.msk.bf16.mxu1 %vm730_vm3, %v5088_v61  ;;  %5941 = vmatprep.mubr.msk.bf16.mxu0 %vm730_vm3, %v6343_v11  ;;  %v6347_v61 = vld [vmem:[%s6524_s27 + $0x48] sm:$0xff]   ;;  %v6398_v11 = vld [vmem:[%s6524_s27 + $0x58] sm:$0xf]  ;;  %v1345_v62 = vrot.slane %v6401_v15, 5  ;;  %v5437_v15 = vld [vmem:[%s6524_s27 + $0x34] sm:$0xf] }
  0xb8   : > { %6304 = vmatprep.subr.msk.bf16.mxu0 %vm779_vm0, %v7155_v26  ;;  %v1338_v16 = vrot.slane %v6398_v11, 5  ;;  %v1333_v31 = vrot.slane %v1331_v57, 4  ;;  %v7235_v47 = vsel %vm6776_vm7, %v5116_v54, %v1331_v57  ;;  %v5432_v57 = vld [vmem:[%s6524_s27 + $0x20] sm:$0x1]  ;;  %v5436_v54 = vld [vmem:[%s6524_s27 + $0x30] sm:$0xf] }
  0xb9   : > { %v5118_v11 = vrot.slane %v1244_v50, 9  ;;  %v3708_v50 = vshll.u32 %v5436_v54, 16  ;;  %v3676_v25 = vshll.u32 %v5432_v57, 16  ;;  %v3714_v36 = vshll.u32 %v5437_v15, 16 }
  0xba   : > { %v7246_v60 = vsel %vm6776_vm7, %v5117_v41, %v1338_v16  ;;  %v7262_v41 = vsel %vm6776_vm7, %v1333_v31, %v1334_v28  ;;  %v1347_v31 = vrot.slane %v1345_v62, 4  ;;  %v3705_v28 = vshrl.u32 %v5436_v54, 16 }
  0xbb   : > { %v7304_v35 = vrot.slane %v3714_v36, 5 }
  0xbd   : > { %5942 = vmatmul.mubr.msk.bf16.gmra.mrb[4].mxu0 %vm730_vm3, %v6345_v37  ;;  %v1340_v37 = vrot.slane %v1338_v16, 4  ;;  %v6402_v16 = vld [vmem:[%s6524_s27 + $0x68] sm:$0x1] }
  0xbe   : > { %5788 = vmatmul.mubr.msk.bf16.gmra.mrb[20].mxu1 %vm730_vm3, %v5089_v6  ;;  %5945 = vmatprep.mubr.msk.bf16.mxu0 %vm730_vm3, %v6347_v61  ;;  %v3662_v6 = vrot.slane %v3660_v8, 5  ;;  %v6349_v61 = vld [vmem:[%s6524_s27 + $0x54] sm:$0xff]   ;;  %v1348_v40 = vrot.slane %v6402_v16, 5  ;;  %v3690_v8 = vshll.u32 %v5434_v39, 16  ;;  %v3673_v16 = vor.u32 %v3672_v12, %v7256_v7 }
  0xbf   : > { %5791 = vmatprep.mubr.msk.bf16.mxu1 %vm730_vm3, %v5090_v9  ;;  %v3681_v9 = vshrl.u32 %v5433_v24, 16  ;;  %v7271_v44 = vsel %vm6776_vm7, %v1340_v37, %v1341_v55  ;;  %v1355_v24 = vrot.slane %v6404_v17, 5  ;;  %v3718_v39 = vshrl.u32 %v5437_v15, 16 }
  0xc0   : > { %v3663_v10 = vor.u32 %v3662_v6, %v3659_v43  ;;  %v7277_v37 = vrot.slane %v3690_v8, 5  ;;  %v3696_v55 = vrot.slane %v3694_v18, 4  ;;  %v8321_v43 = vcombine.low %v6881_v52, %v6892_v46  ;;  %v6405_v8 = vld [vmem:[%s6524_s27 + $0x7c] sm:$0xf]  ;;  %v7313_v18 = vld [vmem:[%s6524_s27 + $0x38] sm:$0x1] }
  0xc1   : > { %v3683_v38 = vrot.slane %v3681_v9, 4  ;;  %v7286_v17 = vsel %vm6776_vm7, %v5118_v11, %v1345_v62  ;;  %v7290_v57 = vsel %vm6776_vm7, %v1347_v31, %v1348_v40  ;;  %v3707_v6 = vrot.slane %v3705_v28, 4  ;;  %8323 = vst [vmem:[#allocation6_spill] sm:$0xff] %v7313_v18 }
  0xc2   : > { %v3710_v12 = vrot.slane %v3708_v50, 5  ;;  %v8322_v52 = vcombine.low %v6913_v33, %v6918_v56  ;;  %v3664_v46 = vrot.slane %v3663_v10, 4  ;;  %v3674_v54 = vrot.slane %v3673_v16, 4  ;;  %v6353_v33 = vld [vmem:[%s6524_s27 + $0x6c] sm:$0xff]   ;;  %v1247_v16 = vld [vmem:[%s6524_s27 + $0x84] sm:$0xe] }
  0xc3   : > { %v3700_v62 = vshll.u32 %v5435_v20, 16  ;;  %v7298_v11 = vsel %vm6776_vm7, %v5119_v5, %v1352_v30  ;;  %v7302_v40 = vsel %vm6776_vm7, %v1354_v48, %v1355_v24  ;;  %v3720_v9 = vrot.slane %v3718_v39, 4  ;;  %v6354_v48 = vld [vmem:[%s6524_s27 + $0x78] sm:$0xff]  }
  0xc4   : > { %v3687_v10 = vor.u32 %v3686_v27, %v3683_v38  ;;  %v3697_v20 = vor.u32 %v3696_v55, %v7277_v37  ;;  %v1359_v30 = vrot.slane %v6405_v8, 5  ;;  %v3711_v38 = vor.u32 %v3710_v12, %v3707_v6  ;;  %v5439_v5 = vld [vmem:[%s6524_s27 + $0x3c] sm:$0xf] }
  0xc5   : > { %5946 = vmatmul.mubr.msk.bf16.gmra.mrb[8].mxu0 %vm730_vm3, %v6349_v61  ;;  %v3678_v61 = vrot.slane %v3676_v25, 5  ;;  %v1246_v25 = vld [vmem:[%s6524_s27 + $0x78] sm:$0xe]  ;;  %v7329_v50 = vrot.slane %v3700_v62, 5  ;;  %v3721_v39 = vor.u32 %v3720_v9, %v7304_v35  ;;  %v3724_v55 = vshll.u32 %v7313_v18, 16 }
  0xc6   : > { %5792 = vmatmul.mubr.msk.bf16.gmra.mrb[24].mxu1 %vm730_vm3, %v8321_v43  ;;  %5949 = vmatprep.mubr.msk.bf16.mxu0 %vm730_vm3, %v6351_v21  ;;  %v3669_v21 = vsel %vm6550_vm4, %v3664_v46, %v7256_v7  ;;  %v5120_v24 = vrot.slane %v1246_v25, 9  ;;  %v6406_v43 = vld [vmem:[%s6524_s27 + $0x88] sm:$0xf]  ;;  %v7337_v7 = vld [vmem:[%s6524_s27 + $0x40] sm:$0xf]  ;;  %v3688_v12 = vrot.slane %v3687_v10, 4  ;;  %v8325_v62 = vcombine.low %v6933_v14, %v6942_v42 }
  0xc7   : > { %5795 = vmatprep.mubr.msk.bf16.mxu1 %vm730_vm3, %v8322_v52  ;;  %v3679_v31 = vsel %vm6550_vm4, %v3674_v54, %v3678_v61  ;;  %v1366_v6 = vrot.slane %v6406_v43, 5  ;;  %8324 = vst [vmem:[#allocation7_spill] sm:$0xff] %v7337_v7  ;;  %v3698_v52 = vrot.slane %v3697_v20, 4  ;;  %v1361_v46 = vrot.slane %v1359_v30, 4  ;;  %v6407_v54 = vld [vmem:[%s6524_s27 + $0x80] sm:$0x1] }
  0xc8   : > { %v1362_v61 = vrot.slane %v6407_v54, 5  ;;  %v3712_v9 = vrot.slane %v3711_v38, 4  ;;  %v5121_v25 = vrot.slane %v1247_v16, 9  ;;  %v3729_v8 = vshrl.u32 %v5439_v5, 16  ;;  %v6355_v10 = vld [vmem:[%s6524_s27 + $0x84] sm:$0xff]  }
  0xc9   : > { %v3732_v43 = vshll.u32 %v5439_v5, 16  ;;  %v7351_v20 = vcombine.low %v3669_v21, %v3679_v31  ;;  %v7355_v14 = vsel %vm779_vm0, %v7155_v26, 0  ;;  %v3742_v38 = vshrl.u32 %v7337_v7, 16  ;;  %v6356_v21 = vld [vmem:[%s6524_s27 + $0x90] sm:$0xff]   ;;  %v6412_v18 = vld [vmem:[%s6524_s27 + $0xa0] sm:$0xf] }
  0xca   : > { %v3722_v16 = vrot.slane %v3721_v39, 4  ;;  %v3726_v5 = vrot.slane %v3724_v55, 5  ;;  %v1368_v54 = vrot.slane %v1366_v6, 4  ;;  %v3693_v31 = vsel %vm6550_vm4, %v3688_v12, %v7277_v37 }
  0xcb   : > { %v3703_v26 = vsel %vm6550_vm4, %v3698_v52, %v7329_v50  ;;  %v7370_v39 = vsel %vm6776_vm7, %v5120_v24, %v1359_v30  ;;  %v7374_v55 = vsel %vm6776_vm7, %v1361_v46, %v1362_v61  ;;  %v3717_v37 = vsel %vm6550_vm4, %v3712_v9, %v7304_v35  ;;  %v5445_v30 = vld [vmem:[%s6524_s27 + $0x54] sm:$0xf]  ;;  %v7391_v24 = vld [vmem:[%s6524_s27 + $0x58] sm:$0xf]  ;;  %v7396_v61 = vld [vmem:[%s6524_s27 + $0x90] sm:$0xe] }
  0xcc   : > { %v7387_v12 = vsel %vm6776_vm7, %v5121_v25, %v1366_v6  ;;  %v3731_v50 = vrot.slane %v3729_v8, 4  ;;  %v3734_v52 = vrot.slane %v3732_v43, 5  ;;  %v3744_v46 = vrot.slane %v3742_v38, 4 }
  0xcd   : > { %5950 = vmatmul.mubr.msk.bf16.gmra.mrb[12].mxu0 %vm730_vm3, %v6353_v33  ;;  %v8326_v33 = vcombine.low %v7140_v0, %v7159_v23  ;;  %v6408_v0 = vld [vmem:[%s6524_s27 + $0x8c] sm:$0x1]  ;;  %v3727_v36 = vsel %vm6550_vm4, %v3722_v16, %v3726_v5  ;;  %v3777_v25 = vshrl.u32 %v5445_v30, 16  ;;  %v3780_v8 = vshll.u32 %v5445_v30, 16 }
  0xce   : > { %5796 = vmatmul.mubr.msk.bf16.gmra.mrb[28].mxu1 %vm730_vm3, %v8325_v62  ;;  %5953 = vmatprep.mubr.msk.bf16.mxu0 %vm730_vm3, %v6354_v48  ;;  %v3738_v48 = vshll.u32 %v7337_v7, 16  ;;  %v1369_v23 = vrot.slane %v6408_v0, 5  ;;  %v5442_v62 = vld [vmem:[%s6524_s27 + $0x48] sm:$0xf]  ;;  %v7380_v0 = vld [vmem:[%s6524_s27 + $0x4c] sm:$0xf]  ;;  %v8328_v38 = vcombine.low %v7144_v29, %v7148_v53  ;;  %v7414_v16 = vcombine.low %v3693_v31, %v3703_v26 }
  0xcf   : > { %5801 = vmatprep.mubr.msk.bf16.mxu1 %vm730_vm3, %v8326_v33  ;;  %v7377_v33 = vld [vmem:[%s6524_s27 + $0x44] sm:$0x1]  ;;  %v3753_v27 = vshrl.u32 %v5442_v62, 16  ;;  %v3756_v15 = vshll.u32 %v5442_v62, 16  ;;  %v3762_v6 = vshll.u32 %v7380_v0, 16  ;;  %v3766_v9 = vshrl.u32 %v7380_v0, 16 }
  0xd0   : > { %8327 = vst [vmem:[#allocation8_spill] sm:$0xff] %v7377_v33  ;;  %v7393_v28 = vrot.slane %v3738_v48, 5  ;;  %v7402_v35 = vsel %vm6776_vm7, %v1368_v54, %v1369_v23  ;;  %v3786_v43 = vshll.u32 %v7391_v24, 16  ;;  %v3790_v48 = vshrl.u32 %v7391_v24, 16  ;;  %v5448_v31 = vld [vmem:[%s6524_s27 + $0x60] sm:$0xf] }
  0xd1   : > { %v3748_v5 = vshll.u32 %v7377_v33, 16  ;;  %v5122_v54 = vrot.slane %v7396_v61, 9  ;;  %v8329_v23 = vcombine.low %v7185_v34, %v7201_v4  ;;  %v7425_v29 = vcombine.low %v3717_v37, %v3727_v36  ;;  %v6357_v26 = vld [vmem:[%s6524_s27 + $0x9c] sm:$0xff]   ;;  %v6358_v30 = vld [vmem:[%s6524_s27 + $0xa8] sm:$0xff]   ;;  %v6409_v36 = vld [vmem:[%s8297_s1 + $0x10] sm:$0xf] }
  0xd2   : > { %v3735_v53 = vor.u32 %v3734_v52, %v3731_v50  ;;  %v3755_v62 = vrot.slane %v3753_v27, 4  ;;  %v7436_v34 = vrot.slane %v3762_v6, 5  ;;  %v3768_v4 = vrot.slane %v3766_v9, 4  ;;  %v6410_v6 = vld [vmem:[%s6524_s27 + $0x94] sm:$0xf] }
  0xd3   : > { %v3779_v27 = vrot.slane %v3777_v25, 4  ;;  %v3782_v37 = vrot.slane %v3780_v8, 5  ;;  %v7445_v50 = vrot.slane %v3786_v43, 5  ;;  %v3792_v52 = vrot.slane %v3790_v48, 4  ;;  %v7451_v9 = vld [vmem:[%s6524_s27 + $0x64] sm:$0xf] }
  0xd4   : > { %8330 = vst [vmem:[#allocation9_spill] sm:$0xff] %v7451_v9  ;;  %v3801_v61 = vshrl.u32 %v5448_v31, 16  ;;  %v7453_v22 = vrot.slane %v3735_v53, 4  ;;  %v1380_v25 = vrot.slane %v6412_v18, 5  ;;  %v3769_v43 = vor.u32 %v3768_v4, %v7436_v34 }
  0xd5   : > { %5954 = vmatmul.mubr.msk.bf16.gmra.mrb[16].mxu0 %vm730_vm3, %v6355_v10  ;;  %v3804_v10 = vshll.u32 %v5448_v31, 16  ;;  %v3783_v31 = vor.u32 %v3782_v37, %v3779_v27  ;;  %v3793_v53 = vor.u32 %v3792_v52, %v7445_v50  ;;  %v8331_v18 = vcombine.low %v7192_v19, %v7205_v58  ;;  %v6359_v37 = vld [vmem:[%s6524_s27 + $0xb4] sm:$0xff]  }
  0xd6   : > { %5802 = vmatmul.mubr.msk.bf16.vlgmr.msra.gmra.mrb[0].mxu1 %vm730_vm3, %v8328_v38  ;;  %5957 = vmatprep.mubr.msk.bf16.mxu0 %vm730_vm3, %v6356_v21  ;;  %v3758_v21 = vrot.slane %v3756_v15, 5  ;;  %v7434_v38 = vld [vmem:[%s6524_s27 + $0x50] sm:$0x1]  ;;  %v7443_v15 = vld [vmem:[%s6524_s27 + $0x5c] sm:$0x1]  ;;  %v8332_v27 = vcombine.low %v7210_v2, %v7214_v1  ;;  %v1382_v52 = vrot.slane %v1380_v25, 4 }
  0xd7   : > { %5834 = vmatpush3.bf16.msra.mxu1 %v7181_v49  ;;  %5805 = vmatprep.mubr.msk.bf16.mxu1 %vm730_vm3, %v8329_v23  ;;  %v3745_v49 = vor.u32 %v3744_v46, %v7393_v28  ;;  %v7447_v46 = vrot.slane %v3748_v5, 5  ;;  %v1373_v23 = vrot.slane %v6410_v6, 5  ;;  %v3772_v48 = vshll.u32 %v7434_v38, 16  ;;  %v1249_v5 = vld [vmem:[%s6524_s27 + $0x9c] sm:$0xe] }
  0xd8   : > { %6300 = vmatprep.subr.msk.bf16.mxu1 %vm779_vm0, %v6409_v36  ;;  %v6411_v36 = vld [vmem:[%s6524_s27 + $0x98] sm:$0x1]  ;;  %v3759_v7 = vor.u32 %v3758_v21, %v3755_v62  ;;  %v3796_v6 = vshll.u32 %v7443_v15, 16  ;;  %v3814_v62 = vshrl.u32 %v7451_v9, 16  ;;  %v3806_v4 = vrot.slane %v3804_v10, 5 }
  0xd9   : > { %v1376_v33 = vrot.slane %v6411_v36, 5  ;;  %v3746_v8 = vrot.slane %v3745_v49, 4  ;;  %v3810_v36 = vshll.u32 %v7451_v9, 16  ;;  %v7472_v21 = vsel %vm6776_vm7, %v5122_v54, %v1373_v23  ;;  %v7483_v2 = vld [vmem:[%s6524_s27 + $0x68] sm:$0x1] }
  0xda   : > { %v3803_v49 = vrot.slane %v3801_v61, 4  ;;  %v3760_v19 = vrot.slane %v3759_v7, 4  ;;  %v5123_v58 = vrot.slane %v1249_v5, 9  ;;  %v3770_v3 = vrot.slane %v3769_v43, 4  ;;  %8333 = vst [vmem:[#allocation10_spill] sm:$0xff] %v7483_v2  ;;  %v6360_v5 = vld [vmem:[%s6524_s27 + $0xc0] sm:$0xff]  }
  0xdb   : > { %v3774_v54 = vrot.slane %v3772_v48, 5  ;;  %v3798_v63 = vrot.slane %v3796_v6, 5  ;;  %v1387_v61 = vrot.slane %v6918_v56, 5  ;;  %v3784_v10 = vrot.slane %v3783_v31, 4  ;;  %v1251_v31 = vld [vmem:[%s6524_s27 + $0xb4] sm:$0xe] }
  0xdc   : > { %v3794_v51 = vrot.slane %v3793_v53, 4  ;;  %v7485_v1 = vrot.slane %v3810_v36, 5  ;;  %v3816_v7 = vrot.slane %v3814_v62, 4  ;;  %v3741_v43 = vsel %vm6550_vm4, %v7453_v22, %v7393_v28  ;;  %v6414_v62 = vld [vmem:[%s6524_s27 + $0xb0] sm:$0x1] }
  0xdd   : > { %5958 = vmatmul.mubr.msk.bf16.gmra.mrb[20].mxu0 %vm730_vm3, %v6357_v26  ;;  %v1375_v26 = vrot.slane %v1373_v23, 4  ;;  %v1250_v23 = vld [vmem:[%s6524_s27 + $0xa8] sm:$0xe]  ;;  %v3751_v48 = vsel %vm6550_vm4, %v3746_v8, %v7447_v46  ;;  %v3807_v6 = vor.u32 %v3806_v4, %v3803_v49  ;;  %v3765_v53 = vsel %vm6550_vm4, %v3760_v19, %v7436_v34  ;;  %v5451_v46 = vld [vmem:[%s6524_s27 + $0x6c] sm:$0xf] }
  0xde   : > { %5806 = vmatmul.mubr.msk.bf16.gmra.mrb[4].mxu1 %vm730_vm3, %v8331_v18  ;;  %5961 = vmatprep.mubr.msk.bf16.mxu0 %vm730_vm3, %v6358_v30  ;;  %v6413_v18 = vld [vmem:[%s6524_s27 + $0xa4] sm:$0x1]  ;;  %v7505_v36 = vsel %vm6776_vm7, %v5123_v58, %v1380_v25  ;;  %v5124_v28 = vrot.slane %v1250_v23, 9  ;;  %v1389_v8 = vrot.slane %v1387_v61, 4  ;;  %v3820_v49 = vshll.u32 %v7483_v2, 16 }
  0xdf   : > { %5809 = vmatprep.mubr.msk.bf16.mxu1 %vm730_vm3, %v8332_v27  ;;  %v1383_v30 = vrot.slane %v6413_v18, 5  ;;  %v7497_v56 = vsel %vm6776_vm7, %v1375_v26, %v1376_v33  ;;  %v3775_v33 = vsel %vm6550_vm4, %v3770_v3, %v3774_v54  ;;  %v1390_v26 = vrot.slane %v6414_v62, 5  ;;  %v5454_v18 = vld [vmem:[%s6524_s27 + $0x78] sm:$0xf]  ;;  %v7560_v54 = vld [vmem:[%s6524_s27 + $0xbc] sm:$0x1] }
  0xe0   : > { %v3789_v34 = vsel %vm6550_vm4, %v3784_v10, %v7445_v50  ;;  %v3799_v25 = vsel %vm6550_vm4, %v3794_v51, %v3798_v63  ;;  %v3817_v4 = vor.u32 %v3816_v7, %v7485_v1  ;;  %v5125_v27 = vrot.slane %v1251_v31, 9  ;;  %v7534_v51 = vld [vmem:[%s6524_s27 + $0x70] sm:$0xf]  ;;  %v7564_v10 = vld [vmem:[%s6524_s27 + $0x7c] sm:$0xf] }
  0xe1   : > { %v7509_v22 = vsel %vm6776_vm7, %v1382_v52, %v1383_v30  ;;  %v8335_v3 = vcombine.low %v7227_v45, %v7231_v59  ;;  %v7530_v19 = vrot.slane %v3807_v6, 4  ;;  %v1394_v50 = vrot.slane %v6942_v42, 5  ;;  %8336 = vst [vmem:[#allocation12_spill] sm:$0xff] %v7534_v51  ;;  %8338 = vst [vmem:[#allocation13_spill] sm:$0xff] %v7564_v10  ;;  %v5457_v7 = vld [vmem:[%s6524_s27 + $0x84] sm:$0xf] }
  0xe2   : > { %8334 = vst [vmem:[#allocation11_spill] sm:$0xff] %v7509_v22  ;;  %v3825_v63 = vshrl.u32 %v5451_v46, 16  ;;  %v8337_v45 = vcombine.low %v7235_v47, %v7262_v41  ;;  %v7542_v58 = vcombine.low %v3765_v53, %v3775_v33  ;;  %v7548_v42 = vsel %vm6776_vm7, %v5124_v28, %v1387_v61  ;;  %v6361_v61 = vld [vmem:[%s6524_s27 + $0xcc] sm:$0xff]   ;;  %v7576_v31 = vld [vmem:[%s6524_s27 + $0x88] sm:$0xf] }
  0xe3   : > { %v7551_v30 = vcombine.low %v3789_v34, %v3799_v25  ;;  %v7555_v47 = vsel %vm6776_vm7, %v1389_v8, %v1390_v26  ;;  %v7557_v41 = vrot.slane %v3820_v49, 5  ;;  %v3834_v6 = vshll.u32 %v7534_v51, 16  ;;  %8339 = vst [vmem:[#allocation14_spill] sm:$0xff] %v7576_v31  ;;  %v5460_v62 = vld [vmem:[%s6524_s27 + $0x90] sm:$0xf] }
  0xe4   : > { %v7582_v28 = vrot.slane %v1394_v50, 4  ;;  %v7584_v33 = vrot.slane %v3825_v63, 4  ;;  %v3838_v8 = vshrl.u32 %v7534_v51, 16  ;;  %v3849_v26 = vshrl.u32 %v5454_v18, 16  ;;  %v7591_v25 = vld [vmem:[%s6524_s27 + $0x94] sm:$0xf] }
  0xe5   : > { %5962 = vmatmul.mubr.msk.bf16.gmra.mrb[24].mxu0 %vm730_vm3, %v6359_v37  ;;  %v7528_v37 = vcombine.low %v3741_v43, %v3751_v48  ;;  %v7572_v43 = vsel %vm6776_vm7, %v5125_v27, %v1394_v50  ;;  %v3828_v48 = vshll.u32 %v5451_v46, 16  ;;  %v3852_v49 = vshll.u32 %v5454_v18, 16  ;;  %8340 = vst [vmem:[#allocation15_spill] sm:$0xff] %v7591_v25  ;;  %v7629_v2 = vld [vmem:[%s6524_s27 + $0x8c] sm:$0x1] }
  0xe6   : > { %5810 = vmatmul.mubr.msk.bf16.gmra.mrb[8].mxu1 %vm730_vm3, %v8335_v3  ;;  %5965 = vmatprep.mubr.msk.bf16.mxu0 %vm730_vm3, %v6360_v5  ;;  %v7568_v5 = vrot.slane %v3817_v4, 4  ;;  %v3858_v46 = vshll.u32 %v7564_v10, 16  ;;  %v3862_v34 = vshrl.u32 %v7564_v10, 16  ;;  %v3873_v4 = vshrl.u32 %v5457_v7, 16 }
  0xe7   : > { %5813 = vmatprep.mubr.msk.bf16.mxu1 %vm730_vm3, %v8337_v45  ;;  %v3876_v27 = vshll.u32 %v5457_v7, 16  ;;  %v3882_v3 = vshll.u32 %v7576_v31, 16  ;;  %v3886_v50 = vshrl.u32 %v7576_v31, 16  ;;  %v7601_v45 = vld [vmem:[%s6524_s27 + $0x74] sm:$0x1]  ;;  %v3830_v18 = vrot.slane %v3828_v48, 5 }
  0xe8   : > { %v3897_v52 = vshrl.u32 %v5460_v62, 16  ;;  %v3900_v53 = vshll.u32 %v5460_v62, 16  ;;  %v8341_v7 = vcombine.low %v7246_v60, %v7271_v44  ;;  %v3840_v59 = vrot.slane %v3838_v8, 4  ;;  %v5463_v48 = vld [vmem:[%s6524_s27 + $0x9c] sm:$0xf] }
  0xe9   : > { %v3906_v63 = vshll.u32 %v7591_v25, 16  ;;  %v3910_v23 = vshrl.u32 %v7591_v25, 16  ;;  %v8342_v62 = vcombine.low %v7286_v17, %v7290_v57  ;;  %v7619_v44 = vld [vmem:[%s6524_s27 + $0x80] sm:$0x1]  ;;  %v3851_v60 = vrot.slane %v3849_v26, 4 }
  0xea   : > { %8343 = vst [vmem:[#allocation16_spill] sm:$0xff] %v7619_v44  ;;  %v3875_v31 = vrot.slane %v3873_v4, 4  ;;  %v3878_v8 = vrot.slane %v3876_v27, 5  ;;  %v7623_v10 = vrot.slane %v3882_v3, 5  ;;  %v3888_v51 = vrot.slane %v3886_v50, 4 }
  0xeb   : > { %v7626_v25 = vld [vmem:[%s6524_s27 + $0xa0] sm:$0xf]  ;;  %v3899_v17 = vrot.slane %v3897_v52, 4  ;;  %v3902_v57 = vrot.slane %v3900_v53, 5  ;;  %v3924_v9 = vshll.u32 %v5463_v48, 16  ;;  %v3831_v26 = vor.u32 %v3830_v18, %v7584_v33 }
  0xec   : > { %v3868_v27 = vshll.u32 %v7619_v44, 16  ;;  %v7638_v3 = vld [vmem:[%s6524_s27 + $0x98] sm:$0x1]  ;;  %v3930_v50 = vshll.u32 %v7626_v25, 16  ;;  %v3934_v52 = vshrl.u32 %v7626_v25, 16  ;;  %v3879_v22 = vor.u32 %v3878_v8, %v3875_v31 }
  0xed   : > { %5966 = vmatmul.mubr.msk.bf16.gmra.mrb[28].mxu0 %vm730_vm3, %v6361_v61  ;;  %v7609_v61 = vrot.slane %v3834_v6, 5  ;;  %v3864_v6 = vrot.slane %v3862_v34, 4  ;;  %v3912_v34 = vrot.slane %v3910_v23, 4  ;;  %v3892_v33 = vshll.u32 %v7629_v2, 16 }
  0xee   : > { %5814 = vmatmul.mubr.msk.bf16.gmra.mrb[12].mxu1 %vm730_vm3, %v8341_v7  ;;  %5971 = vmatprep.mubr.msk.bf16.mxu0 %vm730_vm3, %v7351_v20  ;;  %v3854_v7 = vrot.slane %v3852_v49, 5  ;;  %v7621_v20 = vrot.slane %v3858_v46, 5  ;;  %v3844_v49 = vshll.u32 %v7601_v45, 16  ;;  %v7633_v46 = vrot.slane %v3906_v63, 5 }
  0xef   : > { %5817 = vmatprep.mubr.msk.bf16.mxu1 %vm730_vm3, %v8342_v62  ;;  %v3921_v62 = vshrl.u32 %v5463_v48, 16  ;;  %v3841_v4 = vor.u32 %v3840_v59, %v7609_v61  ;;  %v3889_v23 = vor.u32 %v3888_v51, %v7623_v10  ;;  %v3903_v59 = vor.u32 %v3902_v57, %v3899_v17  ;;  %v7671_v57 = vld [vmem:[%s6524_s27 + $0xa4] sm:$0x1] }
  0xf0   : > { %v3855_v53 = vor.u32 %v3854_v7, %v3851_v60  ;;  %v3865_v48 = vor.u32 %v3864_v6, %v7621_v20  ;;  %v3926_v18 = vrot.slane %v3924_v9, 5  ;;  %v8344_v44 = vcombine.low %v7298_v11, %v7302_v40 }
  0xf1   : > { %v3923_v63 = vrot.slane %v3921_v62, 4  ;;  %v8345_v31 = vrot.slane %v7560_v54, 5  ;;  %v3846_v51 = vrot.slane %v3844_v49, 5  ;;  %v3913_v60 = vor.u32 %v3912_v34, %v7633_v46  ;;  %v7674_v34 = vld [vmem:[%s6524_s27 + $0xac] sm:$0xf] }
  0xf2   : > { %v3916_v9 = vshll.u32 %v7638_v3, 16  ;;  %v8346_v11 = vcombine.low %v7370_v39, %v7374_v55  ;;  %v3832_v40 = vrot.slane %v3831_v26, 4  ;;  %v7667_v54 = vrot.slane %v3930_v50, 5 }
  0xf3   : > { %v3856_v7 = vrot.slane %v3855_v53, 4  ;;  %v3866_v6 = vrot.slane %v3865_v48, 4  ;;  %v3870_v8 = vrot.slane %v3868_v27, 5  ;;  %v3894_v17 = vrot.slane %v3892_v33, 5  ;;  %v7684_v48 = vld [vmem:[%s6524_s27 + $0xb0] sm:$0x1] }
  0xf4   : > { %v3880_v39 = vrot.slane %v3879_v22, 4  ;;  %v3890_v55 = vrot.slane %v3889_v23, 4  ;;  %v3904_v62 = vrot.slane %v3903_v59, 4  ;;  %v3927_v49 = vor.u32 %v3926_v18, %v3923_v63 }
  0xf5   : > { %5972 = vmatmul.mubr.msk.bf16.vlgmr.msra.gmra.mrb[0].mxu0 %vm730_vm3, %v7414_v16  ;;  %v7657_v16 = vsel %vm6776_vm7, %v7582_v28, %v8345_v31  ;;  %v3936_v28 = vrot.slane %v3934_v52, 4  ;;  %v3918_v26 = vrot.slane %v3916_v9, 5  ;;  %v3837_v52 = vsel %vm6550_vm4, %v3832_v40, %v7609_v61 }
  0xf6   : > { %5818 = vmatmul.mubr.msk.bf16.gmra.mrb[16].mxu1 %vm730_vm3, %v8344_v44  ;;  %6004 = vmatpush3.bf16.msra.mxu0 %v7355_v14  ;;  %v3842_v14 = vrot.slane %v3841_v4, 4  ;;  %v5466_v44 = vld [vmem:[%s6524_s27 + $0xa8] sm:$0xf]  ;;  %v3940_v22 = vshll.u32 %v7671_v57, 16  ;;  %v3861_v33 = vsel %vm6550_vm4, %v3856_v7, %v7621_v20  ;;  %v3871_v23 = vsel %vm6550_vm4, %v3866_v6, %v3870_v8 }
  0xf7   : > { %5821 = vmatprep.mubr.msk.bf16.mxu1 %vm730_vm3, %v8346_v11  ;;  %5975 = vmatprep.mubr.msk.bf16.mxu0 %vm730_vm3, %v7425_v29  ;;  %v3914_v29 = vrot.slane %v3913_v60, 4  ;;  %v3945_v4 = vshrl.u32 %v5466_v44, 16  ;;  %v3948_v50 = vshll.u32 %v5466_v44, 16  ;;  %v3937_v53 = vor.u32 %v3936_v28, %v7667_v54  ;;  %v5514_v11 = vld [vmem:[%s6524_s27 + $0x48] sm:$0xe] }
  0xf8   : > { %v3847_v27 = vsel %vm6550_vm4, %v3842_v14, %v3846_v51  ;;  %v3954_v59 = vshll.u32 %v7674_v34, 16  ;;  %v3958_v61 = vshrl.u32 %v7674_v34, 16  ;;  %v3885_v63 = vsel %vm6550_vm4, %v3880_v39, %v7623_v10  ;;  %v7749_v39 = vld [vmem:[%s6524_s27 + $0xb8] sm:$0xf] }
  0xf9   : > { %v3895_v18 = vsel %vm6550_vm4, %v3890_v55, %v3894_v17  ;;  %v3909_v20 = vsel %vm6550_vm4, %v3904_v62, %v7633_v46  ;;  %v3928_v31 = vrot.slane %v3927_v49, 4  ;;  %v8347_v51 = vcombine.low %v7387_v12, %v7402_v35 }
  0xfa   : > { %v3947_v10 = vrot.slane %v3945_v4, 4  ;;  %v3950_v60 = vrot.slane %v3948_v50, 5  ;;  %v3964_v9 = vshll.u32 %v7684_v48, 16  ;;  %v8348_v46 = vcombine.low %v7472_v21, %v7497_v56  ;;  %v5469_v21 = vld [vmem:[%s6524_s27 + $0xb4] sm:$0xf] }
  0xfb   : > { %v5140_v12 = vcombine.low %v7548_v42, %v7555_v47  ;;  %v8349_v35 = vsel %vm6550_vm4, %v7568_v5, %v7557_v41  ;;  %v3938_v14 = vrot.slane %v3937_v53, 4  ;;  %v3942_v28 = vrot.slane %v3940_v22, 5  ;;  %v5516_v4 = vld [vmem:[%s6524_s27 + $0x60] sm:$0xe]  ;;  %v5517_v53 = vld [vmem:[%s6524_s27 + $0x6c] sm:$0xe] }
  0xfc   : > { %v5141_v56 = vcombine.low %v7572_v43, %v7657_v16  ;;  %v7732_v44 = vcombine.low %v3837_v52, %v3847_v27  ;;  %v7734_v42 = vrot.slane %v3954_v59, 5  ;;  %v3960_v47 = vrot.slane %v3958_v61, 4  ;;  %v8358_v16 = vld [vmem:[#allocation4_spill] sm:$0xff] }
  0xfd   : > { %5976 = vmatmul.mubr.msk.bf16.gmra.mrb[4].mxu0 %vm730_vm3, %v7528_v37  ;;  %v3919_v37 = vsel %vm6550_vm4, %v3914_v29, %v3918_v26  ;;  %v7736_v41 = vcombine.low %v3861_v33, %v3871_v23  ;;  %v7738_v5 = vcombine.low %v3885_v63, %v3895_v18  ;;  %v3933_v6 = vsel %vm6550_vm4, %v3928_v31, %v7667_v54  ;;  %v8351_v23 = vld [vmem:[#allocation11_spill] sm:$0xff]  ;;  %v5472_v63 = vld [vmem:[%s6524_s27 + $0xc0] sm:$0xf]  ;;  %v8353_v18 = vld [vmem:[#allocation9_spill] sm:$0xff] }
  0xfe   : > { %5822 = vmatmul.mubr.msk.bf16.gmra.mrb[20].mxu1 %vm730_vm3, %v8347_v51  ;;  %5979 = vmatprep.mubr.msk.bf16.mxu0 %vm730_vm3, %v7542_v58  ;;  %v8350_v58 = vsel %vm6550_vm4, %v7530_v19, %v7485_v1  ;;  %v7740_v7 = vcombine.low %v3909_v20, %v3919_v37  ;;  %v5530_v1 = vrot.slane %v5514_v11, 9  ;;  %v5515_v19 = vld [vmem:[%s6524_s27 + $0x54] sm:$0xe]  ;;  %v3951_v8 = vor.u32 %v3950_v60, %v3947_v10  ;;  %v8354_v31 = vld [vmem:[#allocation10_spill] sm:$0xff] }
  0xff   : > { %5825 = vmatprep.mubr.msk.bf16.mxu1 %vm730_vm3, %v8348_v46  ;;  %v5484_v40 = vcombine.low %v8350_v58, %v8349_v35  ;;  %v7746_v17 = vrot.slane %v3964_v9, 5  ;;  %v3969_v55 = vshrl.u32 %v5469_v21, 16  ;;  %v3943_v62 = vsel %vm6550_vm4, %v3938_v14, %v3942_v28  ;;  %v8355_v9 = vld [vmem:[#allocation12_spill] sm:$0xff]  ;;  %v7798_v35 = vld [vmem:[%s6524_s27 + $0xbc] sm:$0x1] }
 0x100   : > { %v3972_v49 = vshll.u32 %v5469_v21, 16  ;;  %v4427_v29 = vrot.slane %v7380_v0, 5  ;;  %v4430_v26 = vrot.slane %v7434_v38, 5  ;;  %v3961_v50 = vor.u32 %v3960_v47, %v7734_v42  ;;  %v7801_v58 = vld [vmem:[%s6524_s27 + $0xc4] sm:$0xf] }
 0x101   : > { %v5531_v52 = vrot.slane %v5515_v19, 9  ;;  %v4434_v54 = vrot.slane %v7391_v24, 5  ;;  %v4437_v27 = vrot.slane %v7443_v15, 5  ;;  %v3978_v22 = vshll.u32 %v7749_v39, 16  ;;  %v5518_v19 = vld [vmem:[%s6524_s27 + $0x78] sm:$0xe] }
 0x102   : > { %v3982_v33 = vshrl.u32 %v7749_v39, 16  ;;  %v7766_v0 = vsel %vm6776_vm7, %v5530_v1, %v4427_v29  ;;  %v4429_v38 = vrot.slane %v4427_v29, 4  ;;  %v8352_v59 = vcombine.low %v7505_v36, %v8351_v23  ;;  %v8356_v23 = vld [vmem:[#allocation13_spill] sm:$0xff] }
 0x103   : > { %v7773_v24 = vcombine.low %v3933_v6, %v3943_v62  ;;  %v7777_v15 = vsel %vm6776_vm7, %v5531_v52, %v4434_v54  ;;  %v5532_v61 = vrot.slane %v5516_v4, 9  ;;  %v4441_v20 = vrot.slane %v8353_v18, 5  ;;  %v6362_v6 = vld [vmem:[%s6524_s27 + $0xc] sm:$0xff]  }
 0x104   : > { %v7783_v36 = vsel %vm6776_vm7, %v4429_v38, %v4430_v26  ;;  %v4444_v51 = vrot.slane %v8354_v31, 5  ;;  %v5533_v37 = vrot.slane %v5517_v53, 9  ;;  %v4448_v11 = vrot.slane %v8355_v9, 5 }
 0x105   : > { %5980 = vmatmul.mubr.msk.bf16.gmra.mrb[8].mxu0 %vm730_vm3, %v7551_v30  ;;  %v4436_v30 = vrot.slane %v4434_v54, 4  ;;  %v5546_v10 = vcombine.low %v7766_v0, %v7783_v36  ;;  %v4451_v46 = vrot.slane %v7601_v45, 5  ;;  %v7807_v14 = vsel %vm6776_vm7, %v5532_v61, %v4441_v20 }
 0x106   : > { %5826 = vmatmul.mubr.msk.bf16.gmra.mrb[24].mxu1 %vm730_vm3, %v8352_v59  ;;  %5983 = vmatprep.mubr.msk.bf16.mxu0 %vm730_vm3, %v5484_v40  ;;  %v4443_v28 = vrot.slane %v4441_v20, 4  ;;  %v7809_v21 = vrot.slane %v3969_v55, 4  ;;  %v3993_v47 = vshrl.u32 %v5472_v63, 16  ;;  %v7813_v45 = vsel %vm6776_vm7, %v5533_v37, %v4448_v11  ;;  %v5249_v55 = vld [vmem:[%s6524_s27 + $0x78] sm:$0xf]  ;;  %v8357_v59 = vld [vmem:[#allocation16_spill] sm:$0xff] }
 0x107   : > { %5829 = vmatprep.mubr.msk.bf16.mxu1 %vm730_vm3, %v5140_v12  ;;  %v7791_v60 = vsel %vm6776_vm7, %v4436_v30, %v4437_v27  ;;  %v7795_v12 = vrot.slane %v3951_v8, 4  ;;  %v4450_v1 = vrot.slane %v4448_v11, 4  ;;  %v7817_v8 = vrot.slane %v3961_v50, 4 }
 0x108   : > { %v5547_v40 = vcombine.low %v7777_v15, %v7791_v60  ;;  %v7819_v62 = vrot.slane %v3972_v49, 5  ;;  %v3996_v29 = vshll.u32 %v5472_v63, 16  ;;  %v7823_v26 = vsel %vm6776_vm7, %v4443_v28, %v4444_v51  ;;  %v8360_v28 = vld [vmem:[#allocation14_spill] sm:$0xff] }
 0x109   : > { %v7826_v4 = vrot.slane %v3978_v22, 5  ;;  %v7828_v52 = vrot.slane %v3982_v33, 4  ;;  %v5548_v54 = vcombine.low %v7807_v14, %v7823_v26  ;;  %v7834_v27 = vsel %vm6776_vm7, %v4450_v1, %v4451_v46  ;;  %v5519_v33 = vld [vmem:[%s6524_s27 + $0x84] sm:$0xe]  ;;  %v6363_v1 = vld [vmem:[%s6524_s27 + $0x18] sm:$0xff]  }
 0x10a   : > { %v3988_v49 = vshll.u32 %v7798_v35, 16  ;;  %v4002_v50 = vshll.u32 %v7801_v58, 16  ;;  %v5549_v53 = vcombine.low %v7813_v45, %v7834_v27  ;;  %v5534_v22 = vrot.slane %v5518_v19, 9  ;;  %v6425_v60 = vld [vmem:[%s6524_s27 + $0xa0] sm:$0xf] }
 0x10b   : > { %v3995_v38 = vrot.slane %v3993_v47, 4  ;;  %v4458_v30 = vrot.slane %v8357_v59, 5  ;;  %v2318_v61 = vshrl.u32 %v5249_v55, 16  ;;  %v3998_v63 = vrot.slane %v3996_v29, 5  ;;  %v5475_v29 = vld [vmem:[%s6524_s27 + $0xcc] sm:$0xf] }
 0x10c   : > { %v4006_v18 = vshrl.u32 %v7801_v58, 16  ;;  %v2321_v43 = vshll.u32 %v5249_v55, 16  ;;  %v5535_v37 = vrot.slane %v5519_v33, 9  ;;  %v3957_v9 = vsel %vm6550_vm4, %v7795_v12, %v7734_v42  ;;  %v7877_v55 = vld [vmem:[%s6524_s27 + $0xd0] sm:$0xf] }
 0x10d   : > { %5984 = vmatmul.mubr.msk.bf16.gmra.mrb[12].mxu0 %vm730_vm3, %v7732_v44  ;;  %v4455_v44 = vrot.slane %v8356_v23, 5  ;;  %v2320_v51 = vrot.slane %v2318_v61, 4  ;;  %v3975_v11 = vor.u32 %v7819_v62, %v7809_v21  ;;  %v4462_v47 = vrot.slane %v8360_v28, 5  ;;  %v6364_v21 = vld [vmem:[%s6524_s27 + $0x24] sm:$0xff]   ;;  %v6429_v27 = vld [vmem:[%s6524_s27 + $0xac] sm:$0xf] }
 0x10e   : > { %5830 = vmatmul.mubr.msk.bf16.gmra.mrb[28].mxu1 %vm730_vm3, %v5141_v56  ;;  %5987 = vmatprep.mubr.msk.bf16.mxu0 %vm730_vm3, %v7736_v41  ;;  %v8359_v56 = vld [vmem:[#allocation5_spill] sm:$0xff]  ;;  %v2323_v46 = vrot.slane %v2321_v43, 5  ;;  %v3967_v19 = vsel %vm6550_vm4, %v7817_v8, %v7746_v17  ;;  %v4465_v12 = vrot.slane %v7629_v2, 5  ;;  %v7885_v62 = vrot.slane %v4002_v50, 5  ;;  %v5520_v8 = vld [vmem:[%s6524_s27 + $0x90] sm:$0xe] }
 0x10f   : > { %5835 = vmatprep.mubr.msk.bf16.mxu1 %vm730_vm3, %v6362_v6  ;;  %v2340_v41 = vsel %vm6550_vm4, %v8359_v56, %v8358_v16  ;;  %v7859_v20 = vsel %vm6776_vm7, %v5534_v22, %v4455_v44  ;;  %v4457_v31 = vrot.slane %v4455_v44, 4  ;;  %v3985_v6 = vor.u32 %v7828_v52, %v7826_v4  ;;  %v7891_v52 = vld [vmem:[%s6524_s27 + $0xc8] sm:$0x1]  ;;  %v8362_v16 = vld [vmem:[#allocation2_spill] sm:$0xff] }
 0x110   : > { %v4008_v22 = vrot.slane %v4006_v18, 4  ;;  %v2324_v17 = vor.u32 %v2323_v46, %v2320_v51  ;;  %v3990_v23 = vrot.slane %v3988_v49, 5  ;;  %v3999_v44 = vor.u32 %v3998_v63, %v3995_v38  ;;  %v8363_v51 = vld [vmem:[#allocation3_spill] sm:$0xff] }
 0x111   : > { %v7881_v42 = vsel %vm6776_vm7, %v4457_v31, %v4458_v30  ;;  %v7895_v59 = vsel %vm6776_vm7, %v5535_v37, %v4462_v47  ;;  %v4464_v30 = vrot.slane %v4462_v47, 4  ;;  %v4017_v2 = vshrl.u32 %v5475_v29, 16 }
 0x112   : > { %v5550_v33 = vcombine.low %v7859_v20, %v7881_v42  ;;  %v4020_v50 = vshll.u32 %v5475_v29, 16  ;;  %v4026_v61 = vshll.u32 %v7877_v55, 16  ;;  %v2325_v18 = vrot.slane %v2324_v17, 4  ;;  %v6365_v29 = vld [vmem:[%s6524_s27 + $0x30] sm:$0xff]  }
 0x113   : > { %v4030_v49 = vshrl.u32 %v7877_v55, 16  ;;  %v7906_v38 = vsel %vm6776_vm7, %v4464_v30, %v4465_v12  ;;  %v5536_v63 = vrot.slane %v5520_v8, 9  ;;  %v4009_v56 = vor.u32 %v4008_v22, %v7885_v62 }
 0x114   : > { %v4012_v31 = vshll.u32 %v7891_v52, 16  ;;  %v5551_v37 = vcombine.low %v7895_v59, %v7906_v38  ;;  %v5490_v46 = vcombine.low %v3957_v9, %v3967_v19  ;;  %v3976_v28 = vrot.slane %v3975_v11, 4  ;;  %v5521_v11 = vld [vmem:[%s6524_s27 + $0x9c] sm:$0xe] }
 0x115   : > { %5988 = vmatmul.mubr.msk.bf16.gmra.mrb[16].mxu0 %vm730_vm3, %v7738_v5  ;;  %v8361_v5 = vld [vmem:[#allocation15_spill] sm:$0xff]  ;;  %v3986_v47 = vrot.slane %v3985_v6, 4  ;;  %v4000_v12 = vrot.slane %v3999_v44, 4  ;;  %v4472_v8 = vrot.slane %v7638_v3, 5  ;;  %v4019_v30 = vrot.slane %v4017_v2, 4  ;;  %v6366_v19 = vld [vmem:[%s6524_s27 + $0x3c] sm:$0xff]  }
 0x116   : > { %5836 = vmatmul.mubr.msk.bf16.vlgmr.msra.gmra.mrb[0].mxu1 %vm730_vm3, %v6363_v1  ;;  %5991 = vmatprep.mubr.msk.bf16.mxu0 %vm730_vm3, %v7740_v7  ;;  %v4469_v43 = vrot.slane %v8361_v5, 5  ;;  %v2330_v7 = vsel %vm6550_vm4, %v2325_v18, %v8363_v51  ;;  %v4022_v18 = vrot.slane %v4020_v50, 5  ;;  %v7929_v5 = vrot.slane %v4026_v61, 5 }
 0x117   : > { %6038 = vmatpush3.bf16.msra.mxu1 %v8362_v16  ;;  %5839 = vmatprep.mubr.msk.bf16.mxu1 %vm730_vm3, %v6364_v21  ;;  %v7918_v1 = vcombine.low %v2330_v7, %v2340_v41  ;;  %v7922_v21 = vld [vmem:[%s6524_s27 + $0xd4] sm:$0x1]  ;;  %v4032_v9 = vrot.slane %v4030_v49, 4  ;;  %v4010_v41 = vrot.slane %v4009_v56, 4  ;;  %v4014_v6 = vrot.slane %v4012_v31, 5 }
 0x118   : > { %v7926_v22 = vsel %vm6776_vm7, %v5536_v63, %v4469_v43  ;;  %v4471_v17 = vrot.slane %v4469_v43, 4  ;;  %v3981_v63 = vsel %vm6550_vm4, %v3976_v28, %v7826_v4  ;;  %v3991_v2 = vsel %vm6550_vm4, %v3986_v47, %v3990_v23  ;;  %v6416_v16 = vld [vmem:[%s6524_s27 + $0x1c] sm:$0xf]  ;;  %v5522_v28 = vld [vmem:[%s6524_s27 + $0xa8] sm:$0xe] }
 0x119   : > { %v4036_v50 = vshll.u32 %v7922_v21, 16  ;;  %v5537_v61 = vrot.slane %v5521_v11, 9  ;;  %v4476_v49 = vrot.slane %v7626_v25, 5  ;;  %v4005_v4 = vsel %vm6550_vm4, %v4000_v12, %v7885_v62  ;;  %v5510_v62 = vld [vmem:[%s6524_s27 + $0x18] sm:$0xe]  ;;  %v6367_v47 = vld [vmem:[%s6524_s27 + $0x48] sm:$0xff]  }
 0x11a   : > { %v7935_v44 = vsel %vm6776_vm7, %v4471_v17, %v4472_v8  ;;  %v4033_v43 = vor.u32 %v4032_v9, %v7929_v5  ;;  %v4479_v23 = vrot.slane %v7671_v57, 5  ;;  %v4015_v25 = vsel %vm6550_vm4, %v4010_v41, %v4014_v6  ;;  %v6417_v11 = vld [vmem:[%s6524_s27 + $0x20] sm:$0x1] }
 0x11b   : > { %v5552_v3 = vcombine.low %v7926_v22, %v7935_v44  ;;  %v4399_v56 = vrot.slane %v6416_v16, 5  ;;  %v7961_v31 = vsel %vm6776_vm7, %v5537_v61, %v4476_v49  ;;  %v4478_v51 = vrot.slane %v4476_v49, 4  ;;  %v5523_v49 = vld [vmem:[%s6524_s27 + $0xb4] sm:$0xe] }
 0x11c   : > { %v5491_v7 = vcombine.low %v3981_v63, %v3991_v2  ;;  %v4034_v17 = vrot.slane %v4033_v43, 4  ;;  %v5538_v41 = vrot.slane %v5522_v28, 9  ;;  %v4483_v6 = vrot.slane %v7674_v34, 5  ;;  %v5511_v2 = vld [vmem:[%s6524_s27 + $0x24] sm:$0xe] }
 0x11d   : > { %5992 = vmatmul.mubr.msk.bf16.gmra.mrb[20].mxu0 %vm730_vm3, %v7773_v24  ;;  %v4023_v24 = vor.u32 %v4022_v18, %v4019_v30  ;;  %v7966_v57 = vsel %vm6776_vm7, %v4478_v51, %v4479_v23  ;;  %v6368_v30 = vld [vmem:[%s6524_s27 + $0x54] sm:$0xff]   ;;  %v5526_v18 = vrot.slane %v5510_v62, 9  ;;  %v4401_v9 = vrot.slane %v4399_v56, 4  ;;  %v6420_v28 = vld [vmem:[%s6524_s27 + $0x2c] sm:$0x1] }
 0x11e   : > { %5840 = vmatmul.mubr.msk.bf16.gmra.mrb[4].mxu1 %vm730_vm3, %v6365_v29  ;;  %5995 = vmatprep.mubr.msk.bf16.mxu0 %vm730_vm3, %v5490_v46  ;;  %v4038_v46 = vrot.slane %v4036_v50, 5  ;;  %v5492_v29 = vcombine.low %v4005_v4, %v4015_v25  ;;  %v5553_v8 = vcombine.low %v7961_v31, %v7966_v57  ;;  %v4486_v63 = vrot.slane %v7684_v48, 5  ;;  %v6418_v50 = vld [vmem:[%s6524_s27 + $0x28] sm:$0xf]  ;;  %v5512_v25 = vld [vmem:[%s6524_s27 + $0x30] sm:$0xe] }
 0x11f   : > { %5843 = vmatprep.mubr.msk.bf16.mxu1 %vm730_vm3, %v6366_v19  ;;  %v4024_v12 = vrot.slane %v4023_v24, 4  ;;  %v4402_v19 = vrot.slane %v6417_v11, 5  ;;  %v4406_v61 = vrot.slane %v6418_v50, 5  ;;  %v7989_v48 = vsel %vm6776_vm7, %v5538_v41, %v4483_v6  ;;  %v6370_v11 = vld [vmem:[%s6524_s27 + $0x6c] sm:$0xff]   ;;  %v8364_v41 = vld [vmem:[#allocation6_spill] sm:$0xff] }
 0x120   : > { %v4039_v34 = vsel %vm6550_vm4, %v4034_v17, %v4038_v46  ;;  %v4485_v24 = vrot.slane %v4483_v6, 4  ;;  %v4400_v43 = vsel %vm6776_vm7, %v5526_v18, %v4399_v56  ;;  %v5527_v51 = vrot.slane %v5511_v2, 9  ;;  %v5524_v50 = vld [vmem:[%s6524_s27 + $0xc0] sm:$0xe]  ;;  %v6434_v31 = vld [vmem:[%s6524_s27 + $0xc8] sm:$0x1] }
 0x121   : > { %v4029_v4 = vsel %vm6550_vm4, %v4024_v12, %v7929_v5  ;;  %v4403_v23 = vsel %vm6776_vm7, %v4401_v9, %v4402_v19  ;;  %v6419_v5 = vld [vmem:[%s6524_s27 + $0x34] sm:$0xf]  ;;  %v6369_v12 = vld [vmem:[%s6524_s27 + $0x60] sm:$0xff]   ;;  %v5528_v18 = vrot.slane %v5512_v25, 9  ;;  %v4493_v9 = vrot.slane %v7798_v35, 5 }
 0x122   : > { %v4413_v16 = vrot.slane %v6419_v5, 5  ;;  %v8000_v62 = vsel %vm6776_vm7, %v4485_v24, %v4486_v63  ;;  %v5493_v46 = vcombine.low %v4029_v4, %v4039_v34  ;;  %v5542_v17 = vcombine.low %v4400_v43, %v4403_v23  ;;  %v5513_v24 = vld [vmem:[%s6524_s27 + $0x3c] sm:$0xe] }
 0x123   : > { %v5554_v56 = vcombine.low %v7989_v48, %v8000_v62  ;;  %v4416_v6 = vrot.slane %v8364_v41, 5  ;;  %v4407_v35 = vsel %vm6776_vm7, %v5527_v51, %v4406_v61  ;;  %v5540_v5 = vrot.slane %v5524_v50, 9 }
 0x124   : > { %v4415_v19 = vrot.slane %v4413_v16, 4  ;;  %v4414_v23 = vsel %vm6776_vm7, %v5528_v18, %v4413_v16  ;;  %v4500_v51 = vrot.slane %v7891_v52, 5  ;;  %v2481_v57 = vshll.u32 %v6434_v31, 16 }
 0x125   : > { %5996 = vmatmul.mubr.msk.bf16.gmra.mrb[24].mxu0 %vm730_vm3, %v5491_v7  ;;  %v5539_v7 = vrot.slane %v5523_v49, 9 }
 0x126   : > { %5844 = vmatmul.mubr.msk.bf16.gmra.mrb[8].mxu1 %vm730_vm3, %v6367_v47  ;;  %5999 = vmatprep.mubr.msk.bf16.mxu0 %vm730_vm3, %v5492_v29  ;;  %v4409_v47 = vrot.slane %v6420_v28, 5  ;;  %v4490_v29 = vrot.slane %v7749_v39, 5  ;;  %v8365_v39 = vld [vmem:[#allocation7_spill] sm:$0xff]  ;;  %v4417_v25 = vsel %vm6776_vm7, %v4415_v19, %v4416_v6  ;;  %v5529_v28 = vrot.slane %v5513_v24, 9 }
 0x127   : > { %5847 = vmatprep.mubr.msk.bf16.mxu1 %vm730_vm3, %v6368_v30  ;;  %v4408_v30 = vrot.slane %v4406_v61, 4  ;;  %v4420_v49 = vrot.slane %v8365_v39, 5  ;;  %v4497_v61 = vrot.slane %v7801_v58, 5  ;;  %v6421_v39 = vld [vmem:[%s6524_s27 + $0x70] sm:$0xf]  ;;  %v4504_v24 = vrot.slane %v7877_v55, 5 }
 0x128   : > { %v8012_v63 = vsel %vm6776_vm7, %v5539_v7, %v4490_v29  ;;  %v4492_v2 = vrot.slane %v4490_v29, 4  ;;  %v5246_v7 = vld [vmem:[%s6524_s27 + $0x6c] sm:$0xf]  ;;  %v8366_v29 = vld [vmem:[#allocation8_spill] sm:$0xff] }
 0x129   : > { %v4410_v34 = vsel %vm6776_vm7, %v4408_v30, %v4409_v47  ;;  %v4422_v47 = vrot.slane %v4420_v49, 4  ;;  %v6371_v30 = vld [vmem:[%s6524_s27 + $0x78] sm:$0xff]   ;;  %v8043_v16 = vsel %vm6776_vm7, %v5540_v5, %v4497_v61  ;;  %v4499_v18 = vrot.slane %v4497_v61, 4 }
 0x12a   : > { %v8019_v4 = vsel %vm6776_vm7, %v4492_v2, %v4493_v9  ;;  %v5544_v9 = vcombine.low %v4414_v23, %v4417_v25  ;;  %v2294_v19 = vshrl.u32 %v5246_v7, 16  ;;  %v2297_v41 = vshll.u32 %v5246_v7, 16 }
 0x12b   : > { %v5555_v43 = vcombine.low %v8012_v63, %v8019_v4  ;;  %v8048_v58 = vsel %vm6776_vm7, %v4499_v18, %v4500_v51  ;;  %v4421_v6 = vsel %vm6776_vm7, %v5529_v28, %v4420_v49  ;;  %v4507_v49 = vrot.slane %v7922_v21, 5  ;;  %v6373_v51 = vld [vmem:[%s6524_s27 + $0x90] sm:$0xff]   ;;  %v6374_v21 = vld [vmem:[%s6524_s27 + $0x9c] sm:$0xff]  }
 0x12c   : > { %v5556_v50 = vcombine.low %v8043_v16, %v8048_v58  ;;  %v2296_v23 = vrot.slane %v2294_v19, 4  ;;  %v2299_v25 = vrot.slane %v2297_v41, 5  ;;  %v4506_v7 = vrot.slane %v4504_v24, 4 }
 0x12d   : > { %6000 = vmatmul.mubr.msk.bf16.gmra.mrb[28].mxu0 %vm730_vm3, %v5493_v46  ;;  %v5543_v46 = vcombine.low %v4407_v35, %v4410_v34  ;;  %v2303_v35 = vshll.u32 %v6421_v39, 16  ;;  %v2307_v34 = vshrl.u32 %v6421_v39, 16 }
 0x12e   : > { %5848 = vmatmul.mubr.msk.bf16.gmra.mrb[12].mxu1 %vm730_vm3, %v6369_v12  ;;  %6005 = vmatprep.mubr.msk.bf16.mxu0 %vm730_vm3, %v5542_v17  ;;  %v4423_v12 = vrot.slane %v8366_v29, 5  ;;  %v5525_v17 = vld [vmem:[%s6524_s27 + $0xcc] sm:$0xe]  ;;  %v8070_v55 = vsel %vm6776_vm7, %v4506_v7, %v4507_v49 }
 0x12f   : > { %5851 = vmatprep.mubr.msk.bf16.mxu1 %vm730_vm3, %v6370_v11  ;;  %v6372_v11 = vld [vmem:[%s6524_s27 + $0x84] sm:$0xff]   ;;  %v5541_v52 = vrot.slane %v5525_v17, 9  ;;  %v2309_v28 = vrot.slane %v2307_v34, 4  ;;  %v6422_v17 = vld [vmem:[%s6524_s27 + $0x74] sm:$0x1] }
 0x130   : > { %v4424_v2 = vsel %vm6776_vm7, %v4422_v47, %v4423_v12  ;;  %v5252_v47 = vld [vmem:[%s6524_s27 + $0x84] sm:$0xf]  ;;  %v2300_v12 = vor.u32 %v2299_v25, %v2296_v23  ;;  %v6376_v34 = vld [vmem:[%s6524_s27 + $0xb4] sm:$0xff]  }
 0x131   : > { %v8065_v5 = vsel %vm6776_vm7, %v5541_v52, %v4504_v24  ;;  %v5545_v61 = vcombine.low %v4421_v6, %v4424_v2  ;;  %v2345_v18 = vshll.u32 %v5252_v47, 16  ;;  %v5255_v6 = vld [vmem:[%s6524_s27 + $0x90] sm:$0xf]  ;;  %v6375_v2 = vld [vmem:[%s6524_s27 + $0xa8] sm:$0xff]  }
 0x132   : > { %v5557_v29 = vcombine.low %v8065_v5, %v8070_v55  ;;  %v2301_v52 = vrot.slane %v2300_v12, 4  ;;  %v2366_v23 = vshrl.u32 %v5255_v6, 16  ;;  %v2369_v25 = vshll.u32 %v5255_v6, 16 }
 0x133   : > { %v2399_v12 = vshll.u32 %v6425_v60, 16 }
 0x134   : > { %v2371_v14 = vrot.slane %v2369_v25, 5  ;;  %v6428_v25 = vld [vmem:[%s6524_s27 + $0xa4] sm:$0x1] }
 0x135   : > { %6006 = vmatmul.mubr.msk.bf16.vlgmr.msra.gmra.mrb[0].mxu0 %vm730_vm3, %v5543_v46  ;;  %v2305_v46 = vrot.slane %v2303_v35, 5  ;;  %v5258_v35 = vld [vmem:[%s6524_s27 + $0x9c] sm:$0xf]  ;;  %v8112_v6 = vrot.slane %v2399_v12, 5 }
 0x136   : > { %5852 = vmatmul.mubr.msk.bf16.gmra.mrb[16].mxu1 %vm730_vm3, %v6371_v30  ;;  %6009 = vmatprep.mubr.msk.bf16.mxu0 %vm730_vm3, %v5544_v9  ;;  %v2313_v30 = vshll.u32 %v6422_v17, 16  ;;  %v2342_v9 = vshrl.u32 %v5252_v47, 16  ;;  %v2393_v47 = vshll.u32 %v5258_v35, 16  ;;  %v6426_v17 = vld [vmem:[%s6524_s27 + $0x8c] sm:$0x1] }
 0x137   : > { %5855 = vmatprep.mubr.msk.bf16.mxu1 %vm730_vm3, %v6372_v11  ;;  %v2310_v13 = vor.u32 %v2309_v28, %v2305_v46  ;;  %v6423_v11 = vld [vmem:[%s6524_s27 + $0x88] sm:$0xf]  ;;  %v2306_v7 = vsel %vm6550_vm4, %v2301_v52, %v2305_v46 }
 0x138   : > { %v2351_v19 = vshll.u32 %v6423_v11, 16  ;;  %v2355_v41 = vshrl.u32 %v6423_v11, 16  ;;  %v2315_v0 = vrot.slane %v2313_v30, 5  ;;  %v2344_v36 = vrot.slane %v2342_v9, 4 }
 0x139   : > { %v2311_v39 = vrot.slane %v2310_v13, 4  ;;  %v2361_v30 = vshll.u32 %v6426_v17, 16  ;;  %v2368_v9 = vrot.slane %v2366_v23, 4  ;;  %v2395_v11 = vrot.slane %v2393_v47, 5 }
 0x13a   : > { %v8089_v24 = vrot.slane %v2351_v19, 5  ;;  %v2357_v49 = vrot.slane %v2355_v41, 4  ;;  %v6377_v19 = vld [vmem:[%s6524_s27 + $0xc0] sm:$0xff]  }
 0x13b   : > { %v2316_v46 = vsel %vm6550_vm4, %v2311_v39, %v2315_v0  ;;  %v5261_v39 = vld [vmem:[%s6524_s27 + $0xa8] sm:$0xf] }
 0x13c   : > { %v2358_v13 = vor.u32 %v2357_v49, %v8089_v24  ;;  %v5278_v41 = vcombine.low %v2306_v7, %v2316_v46  ;;  %v2409_v7 = vshll.u32 %v6428_v25, 16  ;;  %v2417_v45 = vshll.u32 %v5261_v39, 16 }
 0x13d   : > { %6010 = vmatmul.mubr.msk.bf16.gmra.mrb[4].mxu0 %vm730_vm3, %v5545_v61  ;;  %v6424_v61 = vld [vmem:[%s6524_s27 + $0x94] sm:$0xf] }
 0x13e   : > { %5856 = vmatmul.mubr.msk.bf16.gmra.mrb[20].mxu1 %vm730_vm3, %v6373_v51  ;;  %6013 = vmatprep.mubr.msk.bf16.mxu0 %vm730_vm3, %v5546_v10  ;;  %v2347_v10 = vrot.slane %v2345_v18, 5  ;;  %v2375_v51 = vshll.u32 %v6424_v61, 16  ;;  %v2379_v28 = vshrl.u32 %v6424_v61, 16  ;;  %v2359_v0 = vrot.slane %v2358_v13, 4 }
 0x13f   : > { %5859 = vmatprep.mubr.msk.bf16.mxu1 %vm730_vm3, %v6374_v21  ;;  %v2390_v21 = vshrl.u32 %v5258_v35, 16  ;;  %v6427_v35 = vld [vmem:[%s6524_s27 + $0x98] sm:$0x1]  ;;  %v2414_v61 = vshrl.u32 %v5261_v39, 16  ;;  %v5267_v39 = vld [vmem:[%s6524_s27 + $0xc0] sm:$0xf] }
 0x140   : > { %v2348_v15 = vor.u32 %v2347_v10, %v2344_v36  ;;  %v8109_v26 = vrot.slane %v2375_v51, 5  ;;  %v2363_v36 = vrot.slane %v2361_v30, 5  ;;  %v2372_v10 = vor.u32 %v2371_v14, %v2368_v9  ;;  %v5264_v51 = vld [vmem:[%s6524_s27 + $0xb4] sm:$0xf] }
 0x141   : > { %v2392_v18 = vrot.slane %v2390_v21, 4  ;;  %v2427_v21 = vshrl.u32 %v6429_v27, 16  ;;  %v2438_v20 = vshrl.u32 %v5264_v51, 16  ;;  %v2441_v42 = vshll.u32 %v5264_v51, 16 }
 0x142   : > { %v2349_v52 = vrot.slane %v2348_v15, 4  ;;  %v2364_v46 = vsel %vm6550_vm4, %v2359_v0, %v2363_v36  ;;  %v2373_v15 = vrot.slane %v2372_v10, 4  ;;  %v2411_v30 = vrot.slane %v2409_v7, 5 }
 0x143   : > { %v2396_v23 = vor.u32 %v2395_v11, %v2392_v18  ;;  %v2416_v9 = vrot.slane %v2414_v61, 4  ;;  %v2429_v11 = vrot.slane %v2427_v21, 4  ;;  %v6433_v61 = vld [vmem:[%s6524_s27 + $0xbc] sm:$0x1] }
 0x144   : > { %v2354_v47 = vsel %vm6550_vm4, %v2349_v52, %v8089_v24  ;;  %v2378_v0 = vsel %vm6550_vm4, %v2373_v15, %v8109_v26  ;;  %v2457_v22 = vshll.u32 %v6433_v61, 16 }
 0x145   : > { %6014 = vmatmul.mubr.msk.bf16.gmra.mrb[8].mxu0 %vm730_vm3, %v5547_v40  ;;  %v2403_v40 = vshrl.u32 %v6425_v60, 16  ;;  %v2397_v17 = vrot.slane %v2396_v23, 4  ;;  %v5280_v24 = vcombine.low %v2354_v47, %v2364_v46 }
 0x146   : > { %5860 = vmatmul.mubr.msk.bf16.gmra.mrb[24].mxu1 %vm730_vm3, %v6375_v2  ;;  %6017 = vmatprep.mubr.msk.bf16.mxu0 %vm730_vm3, %v5548_v54  ;;  %v2381_v54 = vrot.slane %v2379_v28, 4 }
 0x147   : > { %5863 = vmatprep.mubr.msk.bf16.mxu1 %vm730_vm3, %v6376_v34  ;;  %v2405_v2 = vrot.slane %v2403_v40, 4  ;;  %v2385_v34 = vshll.u32 %v6427_v35, 16  ;;  %v2402_v10 = vsel %vm6550_vm4, %v2397_v17, %v8112_v6  ;;  %v2483_v17 = vrot.slane %v2481_v57, 5 }
 0x148   : > { %v2382_v49 = vor.u32 %v2381_v54, %v8109_v26  ;;  %v2419_v54 = vrot.slane %v2417_v45, 5  ;;  %v6431_v26 = vld [vmem:[%s6524_s27 + $0xb0] sm:$0x1] }
 0x149   : > { %v2406_v28 = vor.u32 %v2405_v2, %v8112_v6  ;;  %v2387_v60 = vrot.slane %v2385_v34, 5  ;;  %v2433_v35 = vshll.u32 %v6431_v26, 16  ;;  %v2462_v34 = vshrl.u32 %v5267_v39, 16 }
 0x14a   : > { %v2383_v13 = vrot.slane %v2382_v49, 4  ;;  %v2420_v38 = vor.u32 %v2419_v54, %v2416_v9  ;;  %v2465_v6 = vshll.u32 %v5267_v39, 16  ;;  %v6432_v49 = vld [vmem:[%s6524_s27 + $0xc4] sm:$0xf] }
 0x14b   : > { %v2407_v14 = vrot.slane %v2406_v28, 4  ;;  %v2471_v23 = vshll.u32 %v6432_v49, 16  ;;  %v2475_v25 = vshrl.u32 %v6432_v49, 16  ;;  %v2435_v45 = vrot.slane %v2433_v35, 5 }
 0x14c   : > { %v2388_v36 = vsel %vm6550_vm4, %v2383_v13, %v2387_v60  ;;  %v2421_v51 = vrot.slane %v2420_v38, 4  ;;  %v2459_v60 = vrot.slane %v2457_v22, 5 }
 0x14d   : > { %6018 = vmatmul.mubr.msk.bf16.gmra.mrb[12].mxu0 %vm730_vm3, %v5549_v53  ;;  %v2423_v53 = vshll.u32 %v6429_v27, 16  ;;  %v2412_v59 = vsel %vm6550_vm4, %v2407_v14, %v2411_v30  ;;  %v5281_v44 = vcombine.low %v2378_v0, %v2388_v36  ;;  %v2464_v27 = vrot.slane %v2462_v34, 4 }
 0x14e   : > { %5864 = vmatmul.mubr.msk.bf16.gmra.mrb[28].mxu1 %vm730_vm3, %v6377_v19  ;;  %6021 = vmatprep.mubr.msk.bf16.mxu0 %vm730_vm3, %v5550_v33  ;;  %v6430_v33 = vld [vmem:[%s6524_s27 + $0xb8] sm:$0xf]  ;;  %v2440_v19 = vrot.slane %v2438_v20, 4  ;;  %v2473_v21 = vrot.slane %v2471_v23, 5  ;;  %v2477_v47 = vrot.slane %v2475_v25, 4 }
 0x14f   : > { %5885 = vmatprep.mubr.msk.bf16.mxu1 %vm730_vm3, %v5278_v41  ;;  %v2447_v12 = vshll.u32 %v6430_v33, 16  ;;  %v2451_v40 = vshrl.u32 %v6430_v33, 16  ;;  %v2425_v18 = vrot.slane %v2423_v53, 5  ;;  %v2443_v41 = vrot.slane %v2441_v42, 5 }
 0x150   : > { %v2467_v53 = vrot.slane %v2465_v6, 5 }
 0x151   : > { %v2449_v52 = vrot.slane %v2447_v12, 5  ;;  %v2453_v2 = vrot.slane %v2451_v40, 4  ;;  %v2426_v20 = vsel %vm6550_vm4, %v2421_v51, %v2425_v18  ;;  %v2478_v12 = vor.u32 %v2477_v47, %v2473_v21 }
 0x152   : > { %v2468_v33 = vor.u32 %v2467_v53, %v2464_v27 }
 0x153   : > { %v2454_v7 = vor.u32 %v2453_v2, %v2449_v52  ;;  %v2479_v13 = vrot.slane %v2478_v12, 4  ;;  %v8211_v2 = vld [vmem:[%s8298_s2] ss:$0 sm:$0xff] }
 0x154   : > { %v2469_v40 = vrot.slane %v2468_v33, 4 }
 0x155   : > { %6022 = vmatmul.mubr.msk.bf16.gmra.mrb[16].mxu0 %vm730_vm3, %v5551_v37  ;;  %v2430_v37 = vor.u32 %v2429_v11, %v2425_v18  ;;  %v2455_v15 = vrot.slane %v2454_v7, 4  ;;  %v2484_v9 = vsel %vm6550_vm4, %v2479_v13, %v2483_v17 }
 0x156   : > { %5886 = vmatmul.mubr.msk.bf16.vlgmr.msra.gmra.mrb[16].mxu1 %vm730_vm3, %v7918_v1  ;;  %6025 = vmatprep.mubr.msk.bf16.mxu0 %vm730_vm3, %v5552_v3  ;;  %v2444_v1 = vor.u32 %v2443_v41, %v2440_v19  ;;  %v5282_v3 = vcombine.low %v2402_v10, %v2412_v59  ;;  %v2474_v30 = vsel %vm6550_vm4, %v2469_v40, %v2473_v21 }
 0x157   : > { %5889 = vmatprep.mubr.msk.bf16.mxu1 %vm730_vm3, %v5280_v24  ;;  %v2431_v28 = vrot.slane %v2430_v37, 4  ;;  %v2460_v48 = vsel %vm6550_vm4, %v2455_v15, %v2459_v60  ;;  %v5285_v14 = vcombine.low %v2474_v30, %v2484_v9 }
 0x158   : > { %v2445_v46 = vrot.slane %v2444_v1, 4 }
 0x159   : > { %v2436_v42 = vsel %vm6550_vm4, %v2431_v28, %v2435_v45 }
 0x15a   : > { %v5283_v62 = vcombine.low %v2426_v20, %v2436_v42 }
 0x15d   : > { %6026 = vmatmul.mubr.msk.bf16.gmra.mrb[20].mxu0 %vm730_vm3, %v5553_v8  ;;  %v2450_v8 = vsel %vm6550_vm4, %v2445_v46, %v2449_v52 }
 0x15e   : > { %5890 = vmatmul.mubr.msk.bf16.gmra.mrb[20].mxu1 %vm730_vm3, %v5281_v44  ;;  %6029 = vmatprep.mubr.msk.bf16.mxu0 %vm730_vm3, %v5554_v56  ;;  %v5284_v56 = vcombine.low %v2450_v8, %v2460_v48 }
 0x15f   : > { %5893 = vmatprep.mubr.msk.bf16.mxu1 %vm730_vm3, %v5282_v3 }
 0x165   : > { %6030 = vmatmul.mubr.msk.bf16.gmra.mrb[24].mxu0 %vm730_vm3, %v5555_v43 }
 0x166   : > { %5894 = vmatmul.mubr.msk.bf16.gmra.mrb[24].mxu1 %vm730_vm3, %v5283_v62  ;;  %6033 = vmatprep.mubr.msk.bf16.mxu0 %vm730_vm3, %v5556_v50 }
 0x167   : > { %5897 = vmatprep.mubr.msk.bf16.mxu1 %vm730_vm3, %v5284_v56 }
 0x16d   : > { %6034 = vmatmul.mubr.msk.bf16.gmra.mrb[28].mxu0 %vm730_vm3, %v5557_v29 }
 0x16e   : > { %5898 = vmatmul.mubr.msk.bf16.gmra.mrb[28].mxu1 %vm730_vm3, %v5285_v14 }
 0x1e9   : > { %v5837_v63 = vpop.f32.mrb[0].mxu1 }
 0x1ea   : > { %v1894_v4 = vpop.f32.mrb[1].mxu1 }
 0x1eb   : > { %v5838_v43 = vpop.f32.mrb[2].mxu1 }
 0x1ec   : > { %v1897_v16 = vpop.f32.mrb[3].mxu1 }
 0x1f1   : > { %v5841_v58 = vpop.f32.mrb[4].mxu1 }
 0x1f2   : > { %v1910_v50 = vpop.f32.mrb[5].mxu1 }
 0x1f3   : > { %v5842_v54 = vpop.f32.mrb[6].mxu1 }
 0x1f4   : > { %v1913_v18 = vpop.f32.mrb[7].mxu1 }
 0x1f9   : > { %v5845_v11 = vpop.f32.mrb[8].mxu1 }
 0x1fa   : > { %v1926_v32 = vpop.f32.mrb[9].mxu1 }
 0x1fb   : > { %v5846_v24 = vpop.f32.mrb[10].mxu1 }
 0x1fc   : > { %v1929_v19 = vpop.f32.mrb[11].mxu1 }
 0x201   : > { %v8200_v41 = vpop.f32.mrb[12].mxu1 }
 0x202   : > { %v8202_v5 = vpop.f32.mrb[13].mxu1 }
 0x203   : > { %v8204_v55 = vpop.f32.mrb[14].mxu1 }
 0x204   : > { %v8206_v29 = vpop.f32.mrb[15].mxu1 }
 0x208   : > { %v6007_v52 = vpop.f32.mrb[0].mxu0 }
 0x209   : > { %v6039_v39 = vadd.f32 %v6007_v52, %v5837_v63  ;;  %v4643_v0 = vpop.f32.mrb[1].mxu0 }
 0x20a   : > { %v6040_v36 = vadd.f32 %v4643_v0, %v1894_v4  ;;  %v6008_v10 = vpop.f32.mrb[2].mxu0 }
 0x20b   : > { %v4811_v59 = vadd.f32 %v6039_v39, %v8211_v2  ;;  %v6041_v38 = vadd.f32 %v6008_v10, %v5838_v43  ;;  %v4646_v37 = vpop.f32.mrb[3].mxu0 }
 0x20c   : > { %v4809_v26 = vadd.f32 %v6040_v36, %v8211_v2  ;;  %v6042_v35 = vadd.f32 %v4646_v37, %v1897_v16 }
 0x20d   : > { %v4843_v34 = vmax.f32 %v4811_v59, 0.0  ;;  %v4812_v6 = vadd.f32 %v6041_v38, %v8211_v2 }
 0x20e   : > { %v4841_v49 = vmax.f32 %v4809_v26, 0.0  ;;  %v4810_v23 = vadd.f32 %v6042_v35, %v8211_v2 }
 0x20f   : > { %4875 = vst [vmem:[%s8218_s24 + $0x10] sm:$0xff] %v4843_v34  ;;  %v4844_v25 = vmax.f32 %v4812_v6, 0.0 }
 0x210   : > { %4873 = vst [vmem:[%s8218_s24] sm:$0xff] %v4841_v49  ;;  %v4842_v1 = vmax.f32 %v4810_v23, 0.0  ;;  %v6011_v7 = vpop.f32.mrb[4].mxu0 }
 0x211   : > { %4876 = vst [vmem:[%s8218_s24 + $0x18] sm:$0xff] %v4844_v25  ;;  %v6043_v61 = vadd.f32 %v6011_v7, %v5841_v58  ;;  %v4659_v22 = vpop.f32.mrb[5].mxu0 }
 0x212   : > { %4874 = vst [vmem:[%s8218_s24 + $0x8] sm:$0xff] %v4842_v1  ;;  %v6044_v44 = vadd.f32 %v4659_v22, %v1910_v50  ;;  %v6012_v3 = vpop.f32.mrb[6].mxu0 }
 0x213   : > { %v4815_v51 = vadd.f32 %v6043_v61, %v8211_v2  ;;  %v6045_v28 = vadd.f32 %v6012_v3, %v5842_v54  ;;  %v4662_v45 = vpop.f32.mrb[7].mxu0 }
 0x214   : > { %v4813_v27 = vadd.f32 %v6044_v44, %v8211_v2  ;;  %v6046_v53 = vadd.f32 %v4662_v45, %v1913_v18 }
 0x215   : > { %v4847_v21 = vmax.f32 %v4815_v51, 0.0  ;;  %v4816_v47 = vadd.f32 %v6045_v28, %v8211_v2 }
 0x216   : > { %v4845_v46 = vmax.f32 %v4813_v27, 0.0  ;;  %v4814_v15 = vadd.f32 %v6046_v53, %v8211_v2 }
 0x217   : > { %4879 = vst [vmem:[%s8218_s24 + $0x30] sm:$0xff] %v4847_v21  ;;  %v4848_v60 = vmax.f32 %v4816_v47, 0.0 }
 0x218   : > { %4877 = vst [vmem:[%s8218_s24 + $0x20] sm:$0xff] %v4845_v46  ;;  %v4846_v20 = vmax.f32 %v4814_v15, 0.0  ;;  %v6015_v42 = vpop.f32.mrb[8].mxu0 }
 0x219   : > { %4880 = vst [vmem:[%s8218_s24 + $0x38] sm:$0xff] %v4848_v60  ;;  %v6047_v33 = vadd.f32 %v6015_v42, %v5845_v11  ;;  %v4675_v12 = vpop.f32.mrb[9].mxu0 }
 0x21a   : > { %4878 = vst [vmem:[%s8218_s24 + $0x28] sm:$0xff] %v4846_v20  ;;  %v6048_v31 = vadd.f32 %v4675_v12, %v1926_v32  ;;  %v6016_v57 = vpop.f32.mrb[10].mxu0 }
 0x21b   : > { %v4819_v8 = vadd.f32 %v6047_v33, %v8211_v2  ;;  %v6049_v48 = vadd.f32 %v6016_v57, %v5846_v24  ;;  %v4678_v62 = vpop.f32.mrb[11].mxu0 }
 0x21c   : > { %v4817_v56 = vadd.f32 %v6048_v31, %v8211_v2  ;;  %v6050_v40 = vadd.f32 %v4678_v62, %v1929_v19 }
 0x21d   : > { %v4851_v13 = vmax.f32 %v4819_v8, 0.0  ;;  %v4820_v17 = vadd.f32 %v6049_v48, %v8211_v2 }
 0x21e   : > { %v4849_v30 = vmax.f32 %v4817_v56, 0.0  ;;  %v4818_v9 = vadd.f32 %v6050_v40, %v8211_v2 }
 0x21f   : > { %4883 = vst [vmem:[%s8218_s24 + $0x50] sm:$0xff] %v4851_v13  ;;  %v4852_v14 = vmax.f32 %v4820_v17, 0.0 }
 0x220   : > { %4881 = vst [vmem:[%s8218_s24 + $0x40] sm:$0xff] %v4849_v30  ;;  %v4850_v63 = vmax.f32 %v4818_v9, 0.0  ;;  %v6019_v4 = vpop.f32.mrb[12].mxu0 }
 0x221   : > { %4884 = vst [vmem:[%s8218_s24 + $0x58] sm:$0xff] %v4852_v14  ;;  %v6051_v43 = vadd.f32 %v6019_v4, %v8200_v41  ;;  %v4691_v16 = vpop.f32.mrb[13].mxu0 }
 0x222   : > { %4882 = vst [vmem:[%s8218_s24 + $0x48] sm:$0xff] %v4850_v63  ;;  %v6052_v58 = vadd.f32 %v4691_v16, %v8202_v5  ;;  %v6020_v50 = vpop.f32.mrb[14].mxu0 }
 0x223   : > { %v4823_v54 = vadd.f32 %v6051_v43, %v8211_v2  ;;  %v6053_v18 = vadd.f32 %v6020_v50, %v8204_v55  ;;  %v4694_v11 = vpop.f32.mrb[15].mxu0 }
 0x224   : > { %v4821_v32 = vadd.f32 %v6052_v58, %v8211_v2  ;;  %v6054_v24 = vadd.f32 %v4694_v11, %v8206_v29 }
 0x225   : > { %v4855_v19 = vmax.f32 %v4823_v54, 0.0  ;;  %v4824_v41 = vadd.f32 %v6053_v18, %v8211_v2 }
 0x226   : > { %v4853_v52 = vmax.f32 %v4821_v32, 0.0  ;;  %v4822_v39 = vadd.f32 %v6054_v24, %v8211_v2 }
 0x227   : > { %4887 = vst [vmem:[%s8218_s24 + $0x70] sm:$0xff] %v4855_v19  ;;  %v4856_v5 = vmax.f32 %v4824_v41, 0.0 }
 0x228   : > { %4885 = vst [vmem:[%s8218_s24 + $0x60] sm:$0xff] %v4853_v52  ;;  %v4854_v0 = vmax.f32 %v4822_v39, 0.0  ;;  %v6023_v36 = vpop.f32.mrb[16].mxu0 }
 0x229   : > { %4888 = vst [vmem:[%s8218_s24 + $0x78] sm:$0xff] %v4856_v5  ;;  %v5887_v10 = vpop.f32.mrb[16].mxu1  ;;  %v4707_v55 = vpop.f32.mrb[17].mxu0 }
 0x22a   : > { %4886 = vst [vmem:[%s8218_s24 + $0x68] sm:$0xff] %v4854_v0  ;;  %v6055_v59 = vadd.f32 %v6023_v36, %v5887_v10  ;;  %v2683_v38 = vpop.f32.mrb[17].mxu1  ;;  %v6024_v37 = vpop.f32.mrb[18].mxu0 }
 0x22b   : > { %v6056_v29 = vadd.f32 %v4707_v55, %v2683_v38  ;;  %v5888_v26 = vpop.f32.mrb[18].mxu1  ;;  %v4710_v35 = vpop.f32.mrb[19].mxu0 }
 0x22c   : > { %v4827_v34 = vadd.f32 %v6055_v59, %v8211_v2  ;;  %v6057_v6 = vadd.f32 %v6024_v37, %v5888_v26  ;;  %v2686_v49 = vpop.f32.mrb[19].mxu1 }
 0x22d   : > { %v4825_v23 = vadd.f32 %v6056_v29, %v8211_v2  ;;  %v6058_v25 = vadd.f32 %v4710_v35, %v2686_v49 }
 0x22e   : > { %v4859_v1 = vmax.f32 %v4827_v34, 0.0  ;;  %v4828_v7 = vadd.f32 %v6057_v6, %v8211_v2 }
 0x22f   : > { %v4857_v61 = vmax.f32 %v4825_v23, 0.0  ;;  %v4826_v22 = vadd.f32 %v6058_v25, %v8211_v2 }
 0x230   : > { %4891 = vst [vmem:[%s8218_s24 + $0x90] sm:$0xff] %v4859_v1  ;;  %v4860_v44 = vmax.f32 %v4828_v7, 0.0  ;;  %v6027_v3 = vpop.f32.mrb[20].mxu0 }
 0x231   : > { %4889 = vst [vmem:[%s8218_s24 + $0x80] sm:$0xff] %v4857_v61  ;;  %v4858_v51 = vmax.f32 %v4826_v22, 0.0  ;;  %v5891_v28 = vpop.f32.mrb[20].mxu1  ;;  %v4723_v45 = vpop.f32.mrb[21].mxu0 }
 0x232   : > { %4892 = vst [vmem:[%s8218_s24 + $0x98] sm:$0xff] %v4860_v44  ;;  %v6059_v27 = vadd.f32 %v6027_v3, %v5891_v28  ;;  %v2699_v53 = vpop.f32.mrb[21].mxu1  ;;  %v6028_v21 = vpop.f32.mrb[22].mxu0 }
 0x233   : > { %4890 = vst [vmem:[%s8218_s24 + $0x88] sm:$0xff] %v4858_v51  ;;  %v6060_v47 = vadd.f32 %v4723_v45, %v2699_v53  ;;  %v5892_v46 = vpop.f32.mrb[22].mxu1  ;;  %v4726_v15 = vpop.f32.mrb[23].mxu0 }
 0x234   : > { %v4831_v60 = vadd.f32 %v6059_v27, %v8211_v2  ;;  %v6061_v20 = vadd.f32 %v6028_v21, %v5892_v46  ;;  %v2702_v42 = vpop.f32.mrb[23].mxu1 }
 0x235   : > { %v4829_v33 = vadd.f32 %v6060_v47, %v8211_v2  ;;  %v6062_v12 = vadd.f32 %v4726_v15, %v2702_v42 }
 0x236   : > { %v4863_v31 = vmax.f32 %v4831_v60, 0.0  ;;  %v4832_v57 = vadd.f32 %v6061_v20, %v8211_v2 }
 0x237   : > { %v4861_v8 = vmax.f32 %v4829_v33, 0.0  ;;  %v4830_v48 = vadd.f32 %v6062_v12, %v8211_v2 }
 0x238   : > { %4895 = vst [vmem:[%s8218_s24 + $0xb0] sm:$0xff] %v4863_v31  ;;  %v4864_v62 = vmax.f32 %v4832_v57, 0.0  ;;  %v6031_v56 = vpop.f32.mrb[24].mxu0 }
 0x239   : > { %4893 = vst [vmem:[%s8218_s24 + $0xa0] sm:$0xff] %v4861_v8  ;;  %v4862_v40 = vmax.f32 %v4830_v48, 0.0  ;;  %v5895_v13 = vpop.f32.mrb[24].mxu1  ;;  %v4739_v17 = vpop.f32.mrb[25].mxu0 }
 0x23a   : > { %4896 = vst [vmem:[%s8218_s24 + $0xb8] sm:$0xff] %v4864_v62  ;;  %v6063_v30 = vadd.f32 %v6031_v56, %v5895_v13  ;;  %v2715_v9 = vpop.f32.mrb[25].mxu1  ;;  %v6032_v14 = vpop.f32.mrb[26].mxu0 }
 0x23b   : > { %4894 = vst [vmem:[%s8218_s24 + $0xa8] sm:$0xff] %v4862_v40  ;;  %v6064_v63 = vadd.f32 %v4739_v17, %v2715_v9  ;;  %v5896_v4 = vpop.f32.mrb[26].mxu1  ;;  %v4742_v43 = vpop.f32.mrb[27].mxu0 }
 0x23c   : > { %v4835_v16 = vadd.f32 %v6063_v30, %v8211_v2  ;;  %v6065_v58 = vadd.f32 %v6032_v14, %v5896_v4  ;;  %v2718_v50 = vpop.f32.mrb[27].mxu1 }
 0x23d   : > { %v4833_v54 = vadd.f32 %v6064_v63, %v8211_v2  ;;  %v6066_v18 = vadd.f32 %v4742_v43, %v2718_v50 }
 0x23e   : > { %v4867_v11 = vmax.f32 %v4835_v16, 0.0  ;;  %v4836_v32 = vadd.f32 %v6065_v58, %v8211_v2 }
 0x23f   : > { %v4865_v24 = vmax.f32 %v4833_v54, 0.0  ;;  %v4834_v19 = vadd.f32 %v6066_v18, %v8211_v2 }
 0x240   : > { %4899 = vst [vmem:[%s8218_s24 + $0xd0] sm:$0xff] %v4867_v11  ;;  %v4868_v41 = vmax.f32 %v4836_v32, 0.0  ;;  %v6035_v52 = vpop.f32.mrb[28].mxu0 }
 0x241   : > { %4897 = vst [vmem:[%s8218_s24 + $0xc0] sm:$0xff] %v4865_v24  ;;  %v4866_v39 = vmax.f32 %v4834_v19, 0.0  ;;  %v5899_v5 = vpop.f32.mrb[28].mxu1  ;;  %v4755_v0 = vpop.f32.mrb[29].mxu0 }
 0x242   : > { %4900 = vst [vmem:[%s8218_s24 + $0xd8] sm:$0xff] %v4868_v41  ;;  %v6067_v36 = vadd.f32 %v6035_v52, %v5899_v5  ;;  %v2731_v10 = vpop.f32.mrb[29].mxu1  ;;  %v6036_v55 = vpop.f32.mrb[30].mxu0 }
 0x243   : > { %4898 = vst [vmem:[%s8218_s24 + $0xc8] sm:$0xff] %v4866_v39  ;;  %v6068_v59 = vadd.f32 %v4755_v0, %v2731_v10  ;;  %v5900_v38 = vpop.f32.mrb[30].mxu1  ;;  %v4758_v37 = vpop.f32.mrb[31].mxu0 }
 0x244   : > { %v4839_v29 = vadd.f32 %v6067_v36, %v8211_v2  ;;  %v6069_v26 = vadd.f32 %v6036_v55, %v5900_v38  ;;  %v2734_v35 = vpop.f32.mrb[31].mxu1 }
 0x245   : > { %v4837_v34 = vadd.f32 %v6068_v59, %v8211_v2  ;;  %v6070_v6 = vadd.f32 %v4758_v37, %v2734_v35 }
 0x246   : > { %v4871_v49 = vmax.f32 %v4839_v29, 0.0  ;;  %v4840_v23 = vadd.f32 %v6069_v26, %v8211_v2 }
 0x247   : > { %v4869_v25 = vmax.f32 %v4837_v34, 0.0  ;;  %v4838_v1 = vadd.f32 %v6070_v6, %v8211_v2 }
 0x248   : > { %4903 = vst [vmem:[%s8218_s24 + $0xf0] sm:$0xff] %v4871_v49  ;;  %v4872_v7 = vmax.f32 %v4840_v23, 0.0 }
 0x249   : > { %4901 = vst [vmem:[%s8218_s24 + $0xe0] sm:$0xff] %v4869_v25  ;;  %v4870_v61 = vmax.f32 %v4838_v1, 0.0 }
 0x24a   : > { %4904 = vst [vmem:[%s8218_s24 + $0xf8] sm:$0xff] %v4872_v7 }
 0x24b   : > { %4902 = vst [vmem:[%s8218_s24 + $0xe8] sm:$0xff] %v4870_v61 }
 0x24c PF: > { %s13_s14 = sadd.s32 1, %s6457_s14   ;;  %s8367_s12 = smov %s6453_s13 }
 0x24d   : > { %p10_p5 = scmp.ge.s32.totalorder %s13_s14, 4   ;;  %s8368_s13 = smov %s8370_s15 }
 0x24f   :  { %12 = sbr.rel (!%p10_p5) target bundleno = 2 (0x2), region = 71 }

</bundles_post_ra>
